<compile_context>
chip_gen: v7x
topology: tpu7x:2x2x1
jax: 0.10.0
libtpu: 0.0.40
codegen_flags: <defaults>
</compile_context>

<pallas_src>
import math

import numpy as np
import jax
import jax.numpy as jnp
from jax.experimental import pallas as pl
from jax.experimental.pallas import tpu as pltpu


# ----------------------------- linear-map builders ---------------------------

def adaptive_pool_matrix(H, s):
    """P1d[i, h] = 1/len(bin_i) if h in bin_i (PyTorch AdaptiveAvgPool2d rule)."""
    P = np.zeros((s, H), np.float32)
    for i in range(s):
        start = (i * H) // s
        end = math.ceil((i + 1) * H / s)
        P[i, start:end] = 1.0 / (end - start)
    return P


def bilinear_up_matrix(s, H):
    """U1d[h, i]: bilinear interp weights, align_corners=True, s -> H."""
    U = np.zeros((H, s), np.float32)
    if H == 1:
        U[0, 0] = 1.0
        return U
    for h in range(H):
        if s == 1:
            U[h, 0] = 1.0
            continue
        pos = h * (s - 1) / (H - 1)
        i0 = int(math.floor(pos))
        i1 = min(i0 + 1, s - 1)
        frac = pos - i0
        U[h, i0] += 1.0 - frac
        U[h, i1] += frac
    return U


def flattened_pool_matrix(H, W, s):
    Ph = adaptive_pool_matrix(H, s)
    Pw = adaptive_pool_matrix(W, s)
    # Pflat[h*W + w, i*s + j] = Ph[i, h] * Pw[j, w]
    return np.einsum("ih,jw->hwij", Ph, Pw).reshape(H * W, s * s).astype(np.float32)


def flattened_up_matrix(s, H, W):
    Uh = bilinear_up_matrix(s, H)
    Uw = bilinear_up_matrix(s, W)
    # Uflat[i*s + j, h*W + w] = Uh[h, i] * Uw[w, j]
    return np.einsum("hi,wj->ijhw", Uh, Uw).reshape(s * s, H * W).astype(np.float32)


# --------------------------------- Pallas kernel -----------------------------

def make_ppm_kernel(nb, C, M3, HW, Sp, fuse_pool, fold_up):
    """nb images per grid step; C input channels; M3 = 3*cmid; Sp = padded scale dim."""

    def kernel(x_ref, p_ref, w_ref, b_ref, m_ref, u_ref, o_ref):
        x = x_ref[...]                                           # (nb, C, HW) bf16
        # passthrough branch of the concat (channels [0, C)) -- bf16 in, bf16 out
        o_ref[:, 0:C, :] = x.astype(o_ref.dtype)

        # ---- adaptive avg pool: batch folded into the MXU M dimension ----
        if fuse_pool:
            pooled = jnp.dot(x.reshape(nb * C, HW), p_ref[...],
                             preferred_element_type=jnp.float32)     # (nb*C, Sp) f32
            if nb > 1:
                # (nb*C, Sp) -> (C, nb*Sp): batch into the conv's MXU N dimension
                pooled_t = jnp.concatenate(
                    [pooled[b * C:(b + 1) * C, :] for b in range(nb)], axis=1)
            else:
                pooled_t = pooled
        else:
            pooled_t = jnp.concatenate(
                [jnp.dot(x[b], p_ref[...], preferred_element_type=jnp.float32)
                 for b in range(nb)], axis=1)                        # (C, nb*Sp) f32

        # ---- 1x1 conv (BN scale folded into w), all scales & images in ONE matmul ----
        z = jnp.dot(w_ref[...], pooled_t.astype(w_ref.dtype),
                    preferred_element_type=jnp.float32)              # (M3, nb*Sp) f32
        z = z + b_ref[...]                       # folded BN bias (f32, VPU)
        z = z * jax.nn.sigmoid(z)                # SiLU (EUP)
        z = z * m_ref[...]                       # zero cross-scale / padded columns

        # ---- bilinear upsample: batch folded into the MXU M dimension ----
        if fold_up:
            if nb > 1:
                # (M3, nb*Sp) -> (nb*M3, Sp) so the store is one contiguous slab
                zt = jnp.concatenate([z[:, b * Sp:(b + 1) * Sp] for b in range(nb)],
                                     axis=0)
            else:
                zt = z
            branch = jnp.dot(zt.astype(u_ref.dtype), u_ref[...],
                             preferred_element_type=jnp.float32)     # (nb*M3, HW)
            o_ref[:, C:C + M3, :] = branch.reshape(nb, M3, HW).astype(o_ref.dtype)
        else:
            for b in range(nb):
                zb = z[:, b * Sp:(b + 1) * Sp].astype(u_ref.dtype)
                branch_b = jnp.dot(zb, u_ref[...],
                                   preferred_element_type=jnp.float32)
                o_ref[b, C:C + M3, :] = branch_b.astype(o_ref.dtype)

    return kernel


def ppm_forward(x, wconvs, bn_scales, bn_biases, sizes=(2, 3, 6), *,
                nb=None, compute_dtype=jnp.bfloat16):
    """x: (N, C, H, W).  wconvs[k]: (cmid, C); bn_scales/bn_biases[k]: (cmid, 1) so that
    branch_k = SiLU(scale_k * (W_k @ pooled_k) + bias_k).  Returns (N, Cout, H, W) in
    compute_dtype (bf16 output: kernel is HBM-write bound, halves writeback bytes)."""
    N, C, H, W = x.shape
    HW = H * W
    n_sizes = len(sizes)
    cmid = wconvs[0].shape[0]
    M3 = cmid * n_sizes
    Cout = C + M3

    # ---- host-side packing of the exact linear maps (S padded to Sp, zeros masked) ----
    S = sum(s * s for s in sizes)
    Sp = ((S + 63) // 64) * 64
    p_pad = np.zeros((HW, Sp), np.float32)        # padded cols are exactly zero
    u_pad = np.zeros((Sp, HW), np.float32)        # padded rows are exactly zero
    mask_pad = np.zeros((M3, Sp), np.float32)     # padded / cross-scale cols -> 0
    off = 0
    for k, s in enumerate(sizes):
        p_pad[:, off:off + s * s] = flattened_pool_matrix(H, W, s)
        u_pad[off:off + s * s, :] = flattened_up_matrix(s, H, W)
        mask_pad[k * cmid:(k + 1) * cmid, off:off + s * s] = 1.0
        off += s * s
    w_scaled = jnp.concatenate([bn_scales[k] * wconvs[k] for k in range(n_sizes)],
                               axis=0)                              # (M3, C), BN folded
    bias_all = jnp.concatenate(list(bn_biases), axis=0)             # (M3, 1)

    itemsize = np.dtype(compute_dtype).itemsize
    if nb is None:
        # keep >= 2 grid steps (v7x megacore) while filling VMEM-friendly blocks
        per_img = (C + Cout) * HW * itemsize
        budget = 12 << 20
        max_nb = max(1, N // 2)
        cands = [d for d in range(1, max_nb + 1) if N % d == 0 and d * per_img <= budget]
        nb = max(cands) if cands else 1
    assert N % nb == 0, "batch block nb must divide N"

    # batch folding only when the reshapes involved stay layout-trivial (sublane aligned)
    fuse_pool = (C % (8 * (4 // itemsize)) == 0)
    fold_up = (M3 % 8 == 0)

    xf = x.reshape(N, C, HW).astype(compute_dtype)
    consts = [jnp.asarray(p_pad, compute_dtype),                    # (HW, Sp)   bf16
              w_scaled.astype(compute_dtype),                       # (M3, C)    bf16
              bias_all.astype(jnp.float32),                         # (M3, 1)    f32
              jnp.tile(jnp.asarray(mask_pad, jnp.float32), (1, nb)),  # (M3, nb*Sp)
              jnp.asarray(u_pad, compute_dtype)]                    # (Sp, HW)   bf16

    # VMEM provisioning: real block requirement, capped per-generation with headroom.
    try:
        vmem_phys = int(pltpu.get_tpu_info().vmem_capacity_bytes)
    except Exception:
        vmem_phys = 64 << 20                                        # conservative (v7x)
    in_blk = nb * C * HW * itemsize
    out_blk = nb * Cout * HW * itemsize
    const_bytes = sum(int(np.prod(a.shape)) * a.dtype.itemsize for a in consts)
    need = 2 * (in_blk + out_blk) + 2 * const_bytes + (4 << 20)
    vmem_limit = int(min(int(vmem_phys * 0.8), max(32 << 20, need)))

    kernel = make_ppm_kernel(nb, C, M3, HW, Sp, fuse_pool, fold_up)

    def build(single_buffer_consts):
        def const_spec(a):
            r = a.ndim
            idx = lambda n, _r=r: (0,) * _r
            if single_buffer_consts:
                # constant index_map -> fetched once; don't reserve a second buffer
                return pl.BlockSpec(a.shape, idx, pipeline_mode=pl.Buffered(1))
            return pl.BlockSpec(a.shape, idx)

        return pl.pallas_call(
            kernel,
            out_shape=jax.ShapeDtypeStruct((N, Cout, HW), compute_dtype),
            grid_spec=pltpu.PrefetchScalarGridSpec(
                num_scalar_prefetch=0,
                grid=(N // nb,),
                in_specs=[pl.BlockSpec((nb, C, HW), lambda n: (n, 0, 0))]
                         + [const_spec(a) for a in consts],
                out_specs=pl.BlockSpec((nb, Cout, HW), lambda n: (n, 0, 0)),
            ),
            compiler_params=pltpu.CompilerParams(
                dimension_semantics=("parallel",),   # batch steps independent -> megacore
                vmem_limit_bytes=vmem_limit,
            ),
        )

    try:
        out = jax.block_until_ready(build(single_buffer_consts=True)(xf, *consts))
    except Exception:
        # TODO(synk): fall back if this Pallas build rejects pl.Buffered(1) on
        # pallas_call BlockSpecs (constants then use the default double buffer).
        out = build(single_buffer_consts=False)(xf, *consts)

    return out.reshape(N, Cout, H, W)


# ------------------------------- pure-JAX reference --------------------------

def ppm_reference(x, wconvs, bn_scales, bn_biases, sizes):
    N, C, H, W = x.shape
    cmid = wconvs[0].shape[0]
    xf = x.reshape(N, C, H * W)
    outs = [x]
    for k, s in enumerate(sizes):
        P = jnp.asarray(flattened_pool_matrix(H, W, s))
        U = jnp.asarray(flattened_up_matrix(s, H, W))
        pooled = jnp.einsum("ncp,pq->ncq", xf, P)
        z = jnp.einsum("mc,ncq->nmq", wconvs[k], pooled)
        z = z * bn_scales[k][None] + bn_biases[k][None]
        z = z * jax.nn.sigmoid(z)
        up = jnp.einsum("nmq,qp->nmp", z, U)
        outs.append(up.reshape(N, cmid, H, W))
    return jnp.concatenate(outs, axis=1)


# ------------------------------------ main ------------------------------------

if __name__ == "__main__":
    # small demo shapes: cmid = 48 // 3 = 16, Cout = 96, HW = 256 (lane-dense)
    N, C, H, W = 4, 48, 16, 16
    sizes = (2, 3, 6)
    n_sizes = len(sizes)
    cmid = C // n_sizes
    eps = 1e-3

    key = jax.random.PRNGKey(0)
    keys = jax.random.split(key, 1 + n_sizes)
    x = jax.random.normal(keys[0], (N, C, H, W), jnp.float32)

    wconvs, bn_scales, bn_biases = [], [], []
    for i in range(n_sizes):
        wk, gk, bk, mk, vk = jax.random.split(keys[1 + i], 5)
        Wconv = 0.1 * jax.random.normal(wk, (cmid, C), jnp.float32)
        gamma = 1.0 + 0.1 * jax.random.normal(gk, (cmid,), jnp.float32)
        beta = 0.1 * jax.random.normal(bk, (cmid,), jnp.float32)
        mean = 0.1 * jax.random.normal(mk, (cmid,), jnp.float32)
        var = jnp.abs(jax.random.normal(vk, (cmid,), jnp.float32)) + 0.5
        scale = (gamma / jnp.sqrt(var + eps)).reshape(cmid, 1)
        bias = (beta - mean * gamma / jnp.sqrt(var + eps)).reshape(cmid, 1)
        wconvs.append(Wconv)
        bn_scales.append(scale)
        bn_biases.append(bias)

    out = ppm_forward(x, wconvs, bn_scales, bn_biases, sizes)   # nb auto -> 2 grid steps
    out = jax.block_until_ready(out)

    ref = jax.block_until_ready(ppm_reference(x, wconvs, bn_scales, bn_biases, sizes))

    assert out.shape == (N, C + cmid * n_sizes, H, W), out.shape
    out_f32 = np.asarray(out.astype(jnp.float32))
    ref_f32 = np.asarray(ref)
    max_err = float(np.max(np.abs(out_f32 - ref_f32)))
    # bf16 I/O (x, P, W, U and the bf16 output itself) -> relaxed tolerance vs f32 ref
    assert np.allclose(out_f32, ref_f32, atol=6e-2, rtol=6e-2), max_err
    print("KERNEL_OK")
</pallas_src>

<mosaic_0001>
module attributes {stable_mosaic.version = 11 : i64} {
  func.func @kernel(%arg0: i32, %arg1: memref<2x48x256xbf16, #tpu.memory_space<vmem>>, %arg2: memref<256x64xbf16, #tpu.memory_space<vmem>>, %arg3: memref<48x48xbf16, #tpu.memory_space<vmem>>, %arg4: memref<48x1xf32, #tpu.memory_space<vmem>>, %arg5: memref<48x128xf32, #tpu.memory_space<vmem>>, %arg6: memref<64x256xbf16, #tpu.memory_space<vmem>>, %arg7: memref<2x96x256xbf16, #tpu.memory_space<vmem>>) attributes {dimension_semantics = [#tpu.dimension_semantics<parallel>], iteration_bounds = array<i64: 2>, scalar_prefetch = 0 : i64, scratch_operands = 0 : i64, tpu.core_type = #tpu.core_type<tc>, window_params = [{transform_indices = @transform_0, window_bounds = array<i64: 2, 48, 256>}, {pipeline_mode = #tpu.pipeline_mode<synchronous>, transform_indices = @transform_1, window_bounds = array<i64: 256, 64>}, {pipeline_mode = #tpu.pipeline_mode<synchronous>, transform_indices = @transform_2, window_bounds = array<i64: 48, 48>}, {pipeline_mode = #tpu.pipeline_mode<synchronous>, transform_indices = @transform_3, window_bounds = array<i64: 48, 1>}, {pipeline_mode = #tpu.pipeline_mode<synchronous>, transform_indices = @transform_4, window_bounds = array<i64: 48, 128>}, {pipeline_mode = #tpu.pipeline_mode<synchronous>, transform_indices = @transform_5, window_bounds = array<i64: 64, 256>}, {transform_indices = @transform_6, window_bounds = array<i64: 2, 96, 256>}]} {
    %c0 = arith.constant 0 : index
    %c0_0 = arith.constant 0 : index
    %c0_1 = arith.constant 0 : index
    %0 = vector.load %arg1[%c0, %c0_0, %c0_1] : memref<2x48x256xbf16, #tpu.memory_space<vmem>>, vector<2x48x256xbf16>
    %c0_2 = arith.constant 0 : index
    %c0_3 = arith.constant 0 : index
    %c0_4 = arith.constant 0 : index
    %1 = vector.load %arg7[%c0_2, %c0_3, %c0_4] : memref<2x96x256xbf16, #tpu.memory_space<vmem>>, vector<2x48x256xbf16>
    tpu.vector_store %arg7[%c0_2, %c0_3, %c0_4], %0 {strides = array<i32>} : memref<2x96x256xbf16, #tpu.memory_space<vmem>>, vector<2x48x256xbf16>,
    %2 = vector.shape_cast %0 : vector<2x48x256xbf16> to vector<96x256xbf16>
    %c0_5 = arith.constant 0 : index
    %c0_6 = arith.constant 0 : index
    %3 = vector.load %arg2[%c0_5, %c0_6] : memref<256x64xbf16, #tpu.memory_space<vmem>>, vector<256x64xbf16>
    %cst = arith.constant dense<0.000000e+00> : vector<96x64xf32>
    %4 = tpu.matmul %2, %3, %cst {dimension_numbers = #tpu.dot_dimension_numbers<[1], [0], [0], [1], [0, 0, 1, 1], [], []>} : vector<96x256xbf16>, vector<256x64xbf16>, vector<96x64xf32> -> vector<96x64xf32>
    %5 = vector.extract_strided_slice %4 {offsets = [0, 0], sizes = [48, 64], strides = [1, 1]} : vector<96x64xf32> to vector<48x64xf32>
    %6 = vector.extract_strided_slice %4 {offsets = [48, 0], sizes = [48, 64], strides = [1, 1]} : vector<96x64xf32> to vector<48x64xf32>
    %7 = tpu.concatenate %5, %6 in 1 : vector<48x64xf32>, vector<48x64xf32> -> vector<48x128xf32>
    %c0_7 = arith.constant 0 : index
    %c0_8 = arith.constant 0 : index
    %8 = vector.load %arg3[%c0_7, %c0_8] : memref<48x48xbf16, #tpu.memory_space<vmem>>, vector<48x48xbf16>
    %9 = arith.truncf %7 : vector<48x128xf32> to vector<48x128xbf16>
    %cst_9 = arith.constant dense<0.000000e+00> : vector<48x128xf32>
    %10 = tpu.matmul %8, %9, %cst_9 {dimension_numbers = #tpu.dot_dimension_numbers<[1], [0], [0], [1], [0, 0, 1, 1], [], []>} : vector<48x48xbf16>, vector<48x128xbf16>, vector<48x128xf32> -> vector<48x128xf32>
    %c0_10 = arith.constant 0 : index
    %c0_11 = arith.constant 0 : index
    %11 = vector.load %arg4[%c0_10, %c0_11] : memref<48x1xf32, #tpu.memory_space<vmem>>, vector<48x1xf32>
    %12 = vector.broadcast %11 : vector<48x1xf32> to vector<48x128xf32>
    %13 = arith.addf %10, %12 : vector<48x128xf32>
    %14 = arith.negf %13 : vector<48x128xf32>
    %15 = math.exp %14 : vector<48x128xf32>
    %cst_12 = arith.constant 1.000000e+00 : f32
    %16 = vector.broadcast %cst_12 : f32 to vector<48x128xf32>
    %17 = arith.addf %16, %15 : vector<48x128xf32>
    %18 = arith.divf %16, %17 : vector<48x128xf32>
    %19 = arith.mulf %13, %18 : vector<48x128xf32>
    %c0_13 = arith.constant 0 : index
    %c0_14 = arith.constant 0 : index
    %20 = vector.load %arg5[%c0_13, %c0_14] : memref<48x128xf32, #tpu.memory_space<vmem>>, vector<48x128xf32>
    %21 = arith.mulf %19, %20 : vector<48x128xf32>
    %22 = vector.extract_strided_slice %21 {offsets = [0, 0], sizes = [48, 64], strides = [1, 1]} : vector<48x128xf32> to vector<48x64xf32>
    %23 = vector.extract_strided_slice %21 {offsets = [0, 64], sizes = [48, 64], strides = [1, 1]} : vector<48x128xf32> to vector<48x64xf32>
    %24 = tpu.concatenate %22, %23 in 0 : vector<48x64xf32>, vector<48x64xf32> -> vector<96x64xf32>
    %25 = arith.truncf %24 : vector<96x64xf32> to vector<96x64xbf16>
    %c0_15 = arith.constant 0 : index
    %c0_16 = arith.constant 0 : index
    %26 = vector.load %arg6[%c0_15, %c0_16] : memref<64x256xbf16, #tpu.memory_space<vmem>>, vector<64x256xbf16>
    %cst_17 = arith.constant dense<0.000000e+00> : vector<96x256xf32>
    %27 = tpu.matmul %25, %26, %cst_17 {dimension_numbers = #tpu.dot_dimension_numbers<[1], [0], [0], [1], [0, 0, 1, 1], [], []>} : vector<96x64xbf16>, vector<64x256xbf16>, vector<96x256xf32> -> vector<96x256xf32>
    %28 = vector.shape_cast %27 : vector<96x256xf32> to vector<2x48x256xf32>
    %29 = arith.truncf %28 : vector<2x48x256xf32> to vector<2x48x256xbf16>
    %c0_18 = arith.constant 0 : index
    %c48 = arith.constant 48 : index
    %c0_19 = arith.constant 0 : index
    %30 = vector.load %arg7[%c0_18, %c48, %c0_19] : memref<2x96x256xbf16, #tpu.memory_space<vmem>>, vector<2x48x256xbf16>
    tpu.vector_store %arg7[%c0_18, %c48, %c0_19], %29 {strides = array<i32>} : memref<2x96x256xbf16, #tpu.memory_space<vmem>>, vector<2x48x256xbf16>,
    return
  }
  func.func @transform_0(%arg0: i32) -> (i32, i32, i32) {
    %c0_i32 = arith.constant 0 : i32
    %c0_i32_0 = arith.constant 0 : i32
    %c0_i32_1 = arith.constant 0 : i32
    return %arg0, %c0_i32, %c0_i32_0 : i32, i32, i32
  }
  func.func @transform_1(%arg0: i32) -> (i32, i32) {
    %c0_i32 = arith.constant 0 : i32
    %c0_i32_0 = arith.constant 0 : i32
    %c0_i32_1 = arith.constant 0 : i32
    return %c0_i32, %c0_i32_0 : i32, i32
  }
  func.func @transform_2(%arg0: i32) -> (i32, i32) {
    %c0_i32 = arith.constant 0 : i32
    %c0_i32_0 = arith.constant 0 : i32
    %c0_i32_1 = arith.constant 0 : i32
    return %c0_i32, %c0_i32_0 : i32, i32
  }
  func.func @transform_3(%arg0: i32) -> (i32, i32) {
    %c0_i32 = arith.constant 0 : i32
    %c0_i32_0 = arith.constant 0 : i32
    %c0_i32_1 = arith.constant 0 : i32
    return %c0_i32, %c0_i32_0 : i32, i32
  }
  func.func @transform_4(%arg0: i32) -> (i32, i32) {
    %c0_i32 = arith.constant 0 : i32
    %c0_i32_0 = arith.constant 0 : i32
    %c0_i32_1 = arith.constant 0 : i32
    return %c0_i32, %c0_i32_0 : i32, i32
  }
  func.func @transform_5(%arg0: i32) -> (i32, i32) {
    %c0_i32 = arith.constant 0 : i32
    %c0_i32_0 = arith.constant 0 : i32
    %c0_i32_1 = arith.constant 0 : i32
    return %c0_i32, %c0_i32_0 : i32, i32
  }
  func.func @transform_6(%arg0: i32) -> (i32, i32, i32) {
    %c0_i32 = arith.constant 0 : i32
    %c0_i32_0 = arith.constant 0 : i32
    %c0_i32_1 = arith.constant 0 : i32
    return %arg0, %c0_i32, %c0_i32_0 : i32, i32, i32
  }
}

module attributes {stable_mosaic.version = 11 : i64} {
  func.func @kernel(%arg0: i32, %arg1: memref<2x48x256xbf16, #tpu.memory_space<vmem>>, %arg2: memref<256x64xbf16, #tpu.memory_space<vmem>>, %arg3: memref<48x48xbf16, #tpu.memory_space<vmem>>, %arg4: memref<48x1xf32, #tpu.memory_space<vmem>>, %arg5: memref<48x128xf32, #tpu.memory_space<vmem>>, %arg6: memref<64x256xbf16, #tpu.memory_space<vmem>>, %arg7: memref<2x96x256xbf16, #tpu.memory_space<vmem>>) attributes {dimension_semantics = [#tpu.dimension_semantics<parallel>], iteration_bounds = array<i64: 2>, scalar_prefetch = 0 : i64, scratch_operands = 0 : i64, tpu.core_type = #tpu.core_type<tc>, window_params = [{transform_indices = @transform_0, window_bounds = array<i64: 2, 48, 256>}, {pipeline_mode = #tpu.pipeline_mode<synchronous>, transform_indices = @transform_1, window_bounds = array<i64: 256, 64>}, {pipeline_mode = #tpu.pipeline_mode<synchronous>, transform_indices = @transform_2, window_bounds = array<i64: 48, 48>}, {pipeline_mode = #tpu.pipeline_mode<synchronous>, transform_indices = @transform_3, window_bounds = array<i64: 48, 1>}, {pipeline_mode = #tpu.pipeline_mode<synchronous>, transform_indices = @transform_4, window_bounds = array<i64: 48, 128>}, {pipeline_mode = #tpu.pipeline_mode<synchronous>, transform_indices = @transform_5, window_bounds = array<i64: 64, 256>}, {transform_indices = @transform_6, window_bounds = array<i64: 2, 96, 256>}]} {
    %c0 = arith.constant 0 : index
    %c0_0 = arith.constant 0 : index
    %c0_1 = arith.constant 0 : index
    %0 = vector.load %arg1[%c0, %c0_0, %c0_1] : memref<2x48x256xbf16, #tpu.memory_space<vmem>>, vector<2x48x256xbf16>
    %c0_2 = arith.constant 0 : index
    %c0_3 = arith.constant 0 : index
    %c0_4 = arith.constant 0 : index
    %1 = vector.load %arg7[%c0_2, %c0_3, %c0_4] : memref<2x96x256xbf16, #tpu.memory_space<vmem>>, vector<2x48x256xbf16>
    tpu.vector_store %arg7[%c0_2, %c0_3, %c0_4], %0 {strides = array<i32>} : memref<2x96x256xbf16, #tpu.memory_space<vmem>>, vector<2x48x256xbf16>,
    %2 = vector.shape_cast %0 : vector<2x48x256xbf16> to vector<96x256xbf16>
    %c0_5 = arith.constant 0 : index
    %c0_6 = arith.constant 0 : index
    %3 = vector.load %arg2[%c0_5, %c0_6] : memref<256x64xbf16, #tpu.memory_space<vmem>>, vector<256x64xbf16>
    %cst = arith.constant dense<0.000000e+00> : vector<96x64xf32>
    %4 = tpu.matmul %2, %3, %cst {dimension_numbers = #tpu.dot_dimension_numbers<[1], [0], [0], [1], [0, 0, 1, 1], [], []>} : vector<96x256xbf16>, vector<256x64xbf16>, vector<96x64xf32> -> vector<96x64xf32>
    %5 = vector.extract_strided_slice %4 {offsets = [0, 0], sizes = [48, 64], strides = [1, 1]} : vector<96x64xf32> to vector<48x64xf32>
    %6 = vector.extract_strided_slice %4 {offsets = [48, 0], sizes = [48, 64], strides = [1, 1]} : vector<96x64xf32> to vector<48x64xf32>
    %7 = tpu.concatenate %5, %6 in 1 : vector<48x64xf32>, vector<48x64xf32> -> vector<48x128xf32>
    %c0_7 = arith.constant 0 : index
    %c0_8 = arith.constant 0 : index
    %8 = vector.load %arg3[%c0_7, %c0_8] : memref<48x48xbf16, #tpu.memory_space<vmem>>, vector<48x48xbf16>
    %9 = arith.truncf %7 : vector<48x128xf32> to vector<48x128xbf16>
    %cst_9 = arith.constant dense<0.000000e+00> : vector<48x128xf32>
    %10 = tpu.matmul %8, %9, %cst_9 {dimension_numbers = #tpu.dot_dimension_numbers<[1], [0], [0], [1], [0, 0, 1, 1], [], []>} : vector<48x48xbf16>, vector<48x128xbf16>, vector<48x128xf32> -> vector<48x128xf32>
    %c0_10 = arith.constant 0 : index
    %c0_11 = arith.constant 0 : index
    %11 = vector.load %arg4[%c0_10, %c0_11] : memref<48x1xf32, #tpu.memory_space<vmem>>, vector<48x1xf32>
    %12 = vector.broadcast %11 : vector<48x1xf32> to vector<48x128xf32>
    %13 = arith.addf %10, %12 : vector<48x128xf32>
    %14 = arith.negf %13 : vector<48x128xf32>
    %15 = math.exp %14 : vector<48x128xf32>
    %cst_12 = arith.constant 1.000000e+00 : f32
    %16 = vector.broadcast %cst_12 : f32 to vector<48x128xf32>
    %17 = arith.addf %16, %15 : vector<48x128xf32>
    %18 = arith.divf %16, %17 : vector<48x128xf32>
    %19 = arith.mulf %13, %18 : vector<48x128xf32>
    %c0_13 = arith.constant 0 : index
    %c0_14 = arith.constant 0 : index
    %20 = vector.load %arg5[%c0_13, %c0_14] : memref<48x128xf32, #tpu.memory_space<vmem>>, vector<48x128xf32>
    %21 = arith.mulf %19, %20 : vector<48x128xf32>
    %22 = vector.extract_strided_slice %21 {offsets = [0, 0], sizes = [48, 64], strides = [1, 1]} : vector<48x128xf32> to vector<48x64xf32>
    %23 = vector.extract_strided_slice %21 {offsets = [0, 64], sizes = [48, 64], strides = [1, 1]} : vector<48x128xf32> to vector<48x64xf32>
    %24 = tpu.concatenate %22, %23 in 0 : vector<48x64xf32>, vector<48x64xf32> -> vector<96x64xf32>
    %25 = arith.truncf %24 : vector<96x64xf32> to vector<96x64xbf16>
    %c0_15 = arith.constant 0 : index
    %c0_16 = arith.constant 0 : index
    %26 = vector.load %arg6[%c0_15, %c0_16] : memref<64x256xbf16, #tpu.memory_space<vmem>>, vector<64x256xbf16>
    %cst_17 = arith.constant dense<0.000000e+00> : vector<96x256xf32>
    %27 = tpu.matmul %25, %26, %cst_17 {dimension_numbers = #tpu.dot_dimension_numbers<[1], [0], [0], [1], [0, 0, 1, 1], [], []>} : vector<96x64xbf16>, vector<64x256xbf16>, vector<96x256xf32> -> vector<96x256xf32>
    %28 = vector.shape_cast %27 : vector<96x256xf32> to vector<2x48x256xf32>
    %29 = arith.truncf %28 : vector<2x48x256xf32> to vector<2x48x256xbf16>
    %c0_18 = arith.constant 0 : index
    %c48 = arith.constant 48 : index
    %c0_19 = arith.constant 0 : index
    %30 = vector.load %arg7[%c0_18, %c48, %c0_19] : memref<2x96x256xbf16, #tpu.memory_space<vmem>>, vector<2x48x256xbf16>
    tpu.vector_store %arg7[%c0_18, %c48, %c0_19], %29 {strides = array<i32>} : memref<2x96x256xbf16, #tpu.memory_space<vmem>>, vector<2x48x256xbf16>,
    return
  }
  func.func @transform_0(%arg0: i32) -> (i32, i32, i32) {
    %c0_i32 = arith.constant 0 : i32
    %c0_i32_0 = arith.constant 0 : i32
    %c0_i32_1 = arith.constant 0 : i32
    return %arg0, %c0_i32, %c0_i32_0 : i32, i32, i32
  }
  func.func @transform_1(%arg0: i32) -> (i32, i32) {
    %c0_i32 = arith.constant 0 : i32
    %c0_i32_0 = arith.constant 0 : i32
    %c0_i32_1 = arith.constant 0 : i32
    return %c0_i32, %c0_i32_0 : i32, i32
  }
  func.func @transform_2(%arg0: i32) -> (i32, i32) {
    %c0_i32 = arith.constant 0 : i32
    %c0_i32_0 = arith.constant 0 : i32
    %c0_i32_1 = arith.constant 0 : i32
    return %c0_i32, %c0_i32_0 : i32, i32
  }
  func.func @transform_3(%arg0: i32) -> (i32, i32) {
    %c0_i32 = arith.constant 0 : i32
    %c0_i32_0 = arith.constant 0 : i32
    %c0_i32_1 = arith.constant 0 : i32
    return %c0_i32, %c0_i32_0 : i32, i32
  }
  func.func @transform_4(%arg0: i32) -> (i32, i32) {
    %c0_i32 = arith.constant 0 : i32
    %c0_i32_0 = arith.constant 0 : i32
    %c0_i32_1 = arith.constant 0 : i32
    return %c0_i32, %c0_i32_0 : i32, i32
  }
  func.func @transform_5(%arg0: i32) -> (i32, i32) {
    %c0_i32 = arith.constant 0 : i32
    %c0_i32_0 = arith.constant 0 : i32
    %c0_i32_1 = arith.constant 0 : i32
    return %c0_i32, %c0_i32_0 : i32, i32
  }
  func.func @transform_6(%arg0: i32) -> (i32, i32, i32) {
    %c0_i32 = arith.constant 0 : i32
    %c0_i32_0 = arith.constant 0 : i32
    %c0_i32_1 = arith.constant 0 : i32
    return %arg0, %c0_i32, %c0_i32_0 : i32, i32, i32
  }
}

</mosaic_0001>

<bundles_post_ra>
// kernel: tpu_custom_call.1
= control target key start
LH: loop header
LB: loop body
LE: loop exit
PB: predicated region body
PF: predicated region fallthrough
CT: control target
= control target key end

     0   :  { %11 = vsyncpa [#allocation3], 0  ;;  %s2043_s0 = inlined_call_operand.vmem [shape: bf16[4,48,256], index: 0, kind: input, shape index: {}]   ;;  %s2044_s1 = inlined_call_operand.vmem [shape: bf16[256,64], index: 1, kind: input, shape index: {}]   ;;  %s2045_s2 = inlined_call_operand.hbm [shape: bf16[48,48], index: 2, kind: input, shape index: {}]   ;;  %s2046_s3 = inlined_call_operand.vmem [shape: f32[48,1], index: 3, kind: input, shape index: {}]   ;;  %s2047_s4 = inlined_call_operand.hbm [shape: f32[48,128], index: 4, kind: input, shape index: {}]   ;;  %s2048_s5 = inlined_call_operand.vmem [shape: bf16[64,256], index: 5, kind: input, shape index: {}]   ;;  %s2049_s6 = inlined_call_operand.hbm [shape: bf16[4,96,256], index: 6, kind: output, shape index: {}]  }
   0x1   :  { %12 = vsyncpa [#allocation6], 0 }
   0x2   :  { %13 = vsyncpa [#allocation4], 0 }
   0x3   :  { %15 = vsyncpa [#allocation4 + $0x1], 0  ;;  %s1681_s21 = smov 0   ;;  %s1683_s22 = smov 0  }
   0x4   :  { %s1685_s23 = smov 0   ;;  %s1687_s24 = smov 0  }
   0x5 LB: > { %s1702_s25 = sadd.s32 4294967295, %s1631_s24   ;;  %s1164_s26 = sadd.s32 4294967294, %s1631_s24   ;;  %s1631_s24 = sphi %s1687_s24, %s2067_s24   ;;  %s1627_s23 = sphi %s1685_s23, %s2066_s23   ;;  %s1623_s22 = sphi %s1683_s22, %s2065_s22   ;;  %s1619_s21 = sphi %s1681_s21, %s2064_s21  }
   0x6   : > { %s1706_s27 = sadd.s32 1, %s1631_s24   ;;  %s159_s28 = sadd.s32 1, %s1627_s23 }
   0x7   : > { %s156_s29 = ssub.s32 %s1631_s24, %s1706_s27  ;;  %p169_p0 = scmp.ne.s32.totalorder %s1627_s23, %s1623_s22 }
   0x8   : > { %p157_p1 = scmp.eq.s32.totalorder %s156_s29, 0  ;;  %p170_p2 = scmp.eq.s32.totalorder %s1702_s25, 1 }
   0x9   : > { %p175_p3 = scmp.ne.s32.totalorder %s1623_s22, %s1619_s21  ;;  %p176_p4 = scmp.eq.s32.totalorder %s1164_s26, 1 }
   0xa   : > { %s1717_s30 = scalar_select %p157_p1, %s1627_s23, %s159_s28  }
   0xb   : > { %p1719_p5 = por %p170_p2, %p169_p0  ;;  %p1723_p6 = por %p176_p4, %p175_p3 }
   0xc   : > { %p1165_p7 = scmp.ge.s32.totalorder %s1631_s24, 1  ;;  %p183_p8 = scmp.lt.s32.totalorder %s1631_s24, 3 }
   0xd   : > { %s2053_s7 = scalar_select %p1719_p5, 1, 0 }
   0xe   : > { %s2054_s8 = scalar_select %p1723_p6, 1, 0 }
   0xf   : > { %p2050_p9 = scmp.eq.s32.totalorder %s1702_s25, 0  ;;  %p1730_p10 = pnand %p1165_p7, %p183_p8 }
  0x10   : > { %s1633_s10 = smov [#allocation2]   ;;  %s1634_s13 = smov [#allocation5]  }
  0x11   : > { %s2055_s9 = scalar_select %p1730_p10, 1, 0 }
  0x12   : > { %s198_s11 = sshll.u32 %s1633_s10, 4  ;;  %p1346_p11 = pneg %p1730_p10  ;;  %s199_s11 = int_to_ptr.vmem [resolvable:$true] %s198_s11 }
  0x13   : > { %s214_s14 = sshll.u32 %s1634_s13, 4  ;;  %s1505_s17 = scalar_lea.hbm %s2045_s2, 384  ;;  %s1742_s14 = int_to_ptr.vmem [resolvable:$true] %s214_s14 }
  0x14   : > { %p1738_p12 = pnand %p2050_p9, %p1346_p11  ;;  %p1506_p13 = scmp.ne.s32.totalorder %s2045_s2, %s1505_s17 }
  0x15   : > { %p1512_p3 = scmp.lt.u32.totalorder %s1505_s17, %s2045_s2 }
  0x16   : > { %p1507_p0 = pneg %p1738_p12 }
  0x18   : > { %p1508_p1 = pnand %p1507_p0, %p1506_p13 }
  0x1a   : > { %p1509_p2 = pneg %p1508_p1 }
  0x1c   : > { %p1514_p4 = pnand %p1512_p3, %p1509_p2 }
  0x1e   : > { %1517 = shalt.err (!%p1514_p4)
}
  0x1f   : > { %s1518_s28 = scalar_lea.vmem %s199_s11, 384  ;;  %p1526_p9 = scmp.lt.s32.totalorder %s199_s11, %s199_s11 }
  0x20   : > { %p1519_p7 = scmp.ne.s32.totalorder %s199_s11, %s1518_s28  ;;  %p1527_p6 = scmp.lt.s32.totalorder %s1518_s28, %s1518_s28 }
  0x22   : > { %p1521_p8 = pnand %p1519_p7, %p1507_p0  ;;  %p1528_p5 = por %p1527_p6, %p1526_p9 }
  0x24   : > { %p1522_p11 = pneg %p1521_p8 }
  0x26   : > { %p1529_p10 = pnand %p1528_p5, %p1522_p11 }
  0x28   : > { %1532 = shalt.err (!%p1529_p10)
}
  0x29   : > { %s1635_s29 = smov 64   ;;  %s1636_s10 = smov 4  }
  0x2a   : > { %1349 = dma.hbm_to_vmem [thread:$0]  (!%p1738_p12), %s2045_s2, 384, %s199_s11, [#allocation3], %s1635_s29, %s1635_s29, %s1636_s10  }
  0x2b   : > { %s1533_s18 = scalar_lea.hbm %s2047_s4, 768 }
  0x2c   : > { %p1534_p13 = scmp.ne.s32.totalorder %s2047_s4, %s1533_s18  ;;  %p1540_p9 = scmp.lt.u32.totalorder %s1533_s18, %s2047_s4 }
  0x2e   : > { %p1536_p5 = pnand %p1534_p13, %p1507_p0 }
  0x30   : > { %p1537_p6 = pneg %p1536_p5 }
  0x32   : > { %p1542_p10 = pnand %p1540_p9, %p1537_p6 }
  0x34   : > { %1545 = shalt.err (!%p1542_p10)
}
  0x35   : > { %s1546_s11 = scalar_lea.vmem %s1742_s14, 768  ;;  %p1554_p4 = scmp.lt.s32.totalorder %s1742_s14, %s1742_s14 }
  0x36   : > { %p1547_p1 = scmp.ne.s32.totalorder %s1742_s14, %s1546_s11  ;;  %p1555_p7 = scmp.lt.s32.totalorder %s1546_s11, %s1546_s11 }
  0x38   : > { %p1549_p2 = pnand %p1547_p1, %p1507_p0  ;;  %p1556_p8 = por %p1555_p7, %p1554_p4 }
  0x3a   : > { %p1550_p3 = pneg %p1549_p2 }
  0x3c   : > { %p1557_p11 = pnand %p1556_p8, %p1550_p3 }
  0x3e   : > { %1560 = shalt.err (!%p1557_p11)
}
  0x3f   : > { %s1637_s29 = smov 128   ;;  %s1638_s10 = smov 8  }
  0x40   : > { %1352 = dma.hbm_to_vmem [thread:$0]  (!%p1738_p12), %s2047_s4, 768, %s1742_s14, [#allocation6], %s1637_s29, %s1637_s29, %s1638_s10  }
  0x41   : > { %p2057_p13 = scmp.ne.s32.totalorder %s2055_s9, 0 }
  0x42   : > { %p2058_p0 = scmp.eq.s32.totalorder (!%p2057_p13), %s1702_s25, 0 }
  0x43   : > { %243 = sbr.rel (%p2057_p13) target bundleno = 1108 (0x454), region = 44 }
  0x4a   : > { %1606 = dma.done.wait (%p2058_p0), [#allocation3], 384   ;;  %p2059_p5 = pmov %p2058_p0 }
  0x4b   : > { %p2060_p6 = pmov %p2058_p0 }
  0x4c   : > { %1608 = vsyncadd (%p2059_p5), [#allocation3], 4294966912 }
  0x4d   : > { %1610 = dma.done.wait (%p2060_p6), [#allocation6], 768   ;;  %p2061_p9 = pmov %p2058_p0 }
  0x4e   : > { %s1172_s12 = sshll.u32 %s1702_s25, 1  ;;  %v1438_v0 = vld [vmem:[%s2044_s1 + $0x40] sm:$0xff]   ;;  %v1440_v2 = vld [vmem:[%s2044_s1 + $0x48] sm:$0xff]   ;;  %v1442_v4 = vld [vmem:[%s2044_s1 + $0x50] sm:$0xff]   ;;  %s275_s16 = sand.u32 1, %s1623_s22   ;;  %v1639_v58 = vmov 0.0  }
  0x4f   : > { %1612 = vsyncadd (%p2061_p9), [#allocation6], 4294966528  ;;  %v1439_v1 = vld [vmem:[%s2044_s1] sm:$0xff]   ;;  %p279_p12 = scmp.lt.s32.totalorder %s1172_s12, 3  ;;  %1257 = vmatprep.subr.bf16.mxu0 %v1438_v0  ;;  %v1441_v3 = vld [vmem:[%s2044_s1 + $0x8] sm:$0xff]   ;;  %s1333_s20 = smul.u32 192, %s275_s16  ;;  %1315 = vmatprep.subr.bf16.mxu1 %v1639_v58 }
  0x50   : > { %1258 = vmatpush3.bf16.msra.mxu0 %v1439_v1  ;;  %v1443_v5 = vld [vmem:[%s2044_s1 + $0x10] sm:$0xff]   ;;  %v1444_v6 = vld [vmem:[%s2044_s1 + $0x58] sm:$0xff]   ;;  %v1446_v8 = vld [vmem:[%s2044_s1 + $0x60] sm:$0xff]   ;;  %vm1641_vm0 = vmmov 0   ;;  %vm604_vm1 = vcmask 523264   ;;  %vm671_vm2 = vcmask 392192  }
  0x51   : > { %1259 = vmatprep.subr.bf16.mxu0 %v1440_v2  ;;  %s2069_s12 = smov (!%p279_p12, %s1172_s12), 3  ;;  %v1445_v7 = vld [vmem:[%s2044_s1 + $0x18] sm:$0xff]   ;;  %v1447_v9 = vld [vmem:[%s2044_s1 + $0x20] sm:$0xff]   ;;  %v1448_v10 = vld [vmem:[%s2044_s1 + $0x68] sm:$0xff]   ;;  %s1849_s9 = scalar_lea.vmem [#allocation7], %s1333_s20  ;;  %1321 = vmatprep.mubr.msk.bf16.mxu1 %vm1641_vm0, %v1639_v58 }
  0x52   : > { %s1334_s14 = smul.u32 48, %s2069_s12  ;;  %v1449_v14 = vld [vmem:[%s2044_s1 + $0x28] sm:$0xff]   ;;  %v1450_v19 = vld [vmem:[%s2044_s1 + $0x70] sm:$0xff]   ;;  %v1452_v27 = vld [vmem:[%s2044_s1 + $0x78] sm:$0xff]   ;;  %s1080_s17 = sshll.u32 %s1849_s9, 4  ;;  %s1996_s17 = int_to_ptr.vmem [resolvable:$true] %s1080_s17 }
  0x53   : > { %v1451_v26 = vld [vmem:[%s2044_s1 + $0x30] sm:$0xff]   ;;  %v1453_v28 = vld [vmem:[%s2044_s1 + $0x38] sm:$0xff]   ;;  %s1561_s26 = scalar_lea.vmem %s1996_s17, 3072  ;;  %p2062_p1 = scmp.ne.s32.totalorder %s2053_s7, 0 }
  0x54   : > { %1260 = vmatpush3.bf16.msra.mxu0 %v1441_v3  ;;  %s1835_s11 = scalar_lea.vmem %s2043_s0, %s1334_s14  ;;  %p1562_p10 = scmp.ne.s32.totalorder %s1996_s17, %s1561_s26 }
  0x55   : > { %1261 = vmatprep.subr.bf16.mxu0 %v1442_v4  ;;  %v287_v11 = vld [vmem:[%s1835_s11] sm:$0xff]  ;;  %v288_v12 = vld [vmem:[%s1835_s11 + $0x8] sm:$0xff]  ;;  %v289_v13 = vld [vmem:[%s1835_s11 + $0x10] sm:$0xff]  ;;  %s1643_s28 = smov [#allocation7]  }
  0x56   : > { %299 = vst [vmem:[%s1849_s9] sm:$0xff] %v287_v11  ;;  %300 = vst [vmem:[%s1849_s9 + $0x8] sm:$0xff] %v288_v12  ;;  %v1175_v15 = vcombine.high %v287_v11, %v288_v12  ;;  %v290_v16 = vld [vmem:[%s1835_s11 + $0x18] sm:$0xff]  ;;  %v291_v17 = vld [vmem:[%s1835_s11 + $0x20] sm:$0xff]  ;;  %v1174_v29 = vcombine.low %v287_v11, %v288_v12  ;;  %p1563_p2 = pnand %p1562_p10, %p2062_p1  ;;  %s1565_s29 = sshll.u32 %s1643_s28, 4  ;;  %s1566_s29 = int_to_ptr.vmem [resolvable:$false] %s1565_s29 }
  0x57   : > { %301 = vst [vmem:[%s1849_s9 + $0x10] sm:$0xff] %v289_v13  ;;  %v292_v18 = vld [vmem:[%s1835_s11 + $0x28] sm:$0xff]  ;;  %302 = vst [vmem:[%s1849_s9 + $0x18] sm:$0xff] %v290_v16  ;;  %v293_v20 = vld [vmem:[%s1835_s11 + $0x30] sm:$0xff]  ;;  %v1177_v30 = vcombine.high %v289_v13, %v290_v16  ;;  %v1176_v31 = vcombine.low %v289_v13, %v290_v16  ;;  %s1567_s10 = scalar_lea.vmem %s1566_s29, 6144  ;;  %p1568_p4 = scmp.lt.s32.totalorder %s1996_s17, %s1566_s29 }
  0x58   : > { %1262 = vmatpush3.bf16.msra.mxu0 %v1443_v5  ;;  %303 = vst [vmem:[%s1849_s9 + $0x20] sm:$0xff] %v291_v17  ;;  %304 = vst [vmem:[%s1849_s9 + $0x28] sm:$0xff] %v292_v18  ;;  %v294_v21 = vld [vmem:[%s1835_s11 + $0x38] sm:$0xff]  ;;  %v295_v22 = vld [vmem:[%s1835_s11 + $0x40] sm:$0xff]  ;;  %531 = vmatprep.mubr.bf16.mxu0 %v1175_v15  ;;  %v1179_v32 = vcombine.high %v291_v17, %v292_v18  ;;  %v1178_v33 = vcombine.low %v291_v17, %v292_v18  ;;  %v1642_v17 = vmov 0   ;;  %p1564_p3 = pneg %p1563_p2  ;;  %p1569_p7 = scmp.lt.s32.totalorder %s1567_s10, %s1561_s26 }
  0x59   : > { %1263 = vmatprep.subr.bf16.mxu0 %v1444_v6  ;;  %305 = vst [vmem:[%s1849_s9 + $0x60] sm:$0xff] %v293_v20  ;;  %306 = vst [vmem:[%s1849_s9 + $0x68] sm:$0xff] %v294_v21  ;;  %v296_v23 = vld [vmem:[%s1835_s11 + $0x48] sm:$0xff]  ;;  %v297_v24 = vld [vmem:[%s1835_s11 + $0x50] sm:$0xff]  ;;  %v1181_v34 = vcombine.high %v293_v20, %v294_v21  ;;  %v1180_v35 = vcombine.low %v293_v20, %v294_v21  ;;  %1421 = vset.pattern.permute.xlu1 %v1642_v17 }
  0x5a   : > { %307 = vst [vmem:[%s1849_s9 + $0x70] sm:$0xff] %v295_v22  ;;  %v298_v25 = vld [vmem:[%s1835_s11 + $0x58] sm:$0xff]  ;;  %308 = vst [vmem:[%s1849_s9 + $0x78] sm:$0xff] %v296_v23  ;;  %v1183_v36 = vcombine.high %v295_v22, %v296_v23  ;;  %v1182_v37 = vcombine.low %v295_v22, %v296_v23  ;;  %s1640_s11 = smov 64   ;;  %v620_v16 = vld [vmem:[%s2046_s3] sm:$0xff]  ;;  %1422 = vset.pattern.permute.xlu0 %v1642_v17  ;;  %p1570_p8 = por %p1569_p7, %p1568_p4 }
  0x5b   : > { %309 = vst [vmem:[%s1849_s9 + $0x80] sm:$0xff] %v297_v24  ;;  %310 = vst [vmem:[%s1849_s9 + $0x88] sm:$0xff] %v298_v25  ;;  %v1185_v38 = vcombine.high %v297_v24, %v298_v25  ;;  %v1184_v39 = vcombine.low %v297_v24, %v298_v25  ;;  %v621_v18 = vld [vmem:[%s2046_s3 + $0x8] sm:$0xff]  ;;  %v624_v20 = vld [vmem:[%s2046_s3 + $0x20] sm:$0xff] }
  0x5c   : > { %1264 = vmatpush3.bf16.msra.mxu0 %v1445_v7  ;;  %v623_v21 = vld [vmem:[%s2046_s3 + $0x18] sm:$0xff]  ;;  %v625_v22 = vld [vmem:[%s2046_s3 + $0x28] sm:$0xff]  ;;  %p1571_p11 = pnand %p1570_p8, %p1564_p3 }
  0x5d   : > { %1265 = vmatprep.subr.bf16.mxu0 %v1446_v8 }
  0x60   : > { %1266 = vmatpush3.bf16.msra.mxu0 %v1447_v9 }
  0x61   : > { %1267 = vmatprep.subr.bf16.mxu0 %v1448_v10 }
  0x64   : > { %1268 = vmatpush3.bf16.msra.mxu0 %v1449_v14 }
  0x65   : > { %1269 = vmatprep.subr.bf16.mxu0 %v1450_v19  ;;  %v622_v19 = vld [vmem:[%s2046_s3 + $0x10] sm:$0xff] }
  0x68   : > { %1270 = vmatpush3.bf16.msra.mxu0 %v1451_v26 }
  0x69   : > { %1271 = vmatprep.subr.bf16.mxu0 %v1452_v27 }
  0x6c   : > { %1272 = vmatpush3.bf16.msra.mxu0 %v1453_v28 }
  0x6f   : > { %532 = vmatmul.mubr.bf16.vlgmr.msra.gmra.mrb[0].mxu0 %v1174_v29 }
  0x70   : > { %539 = vmatprep.mubr.bf16.mxu0 %v1177_v30 }
  0x77   : > { %540 = vmatmul.mubr.bf16.gmra.mrb[4].mxu0 %v1176_v31 }
  0x78   : > { %547 = vmatprep.mubr.bf16.mxu0 %v1179_v32 }
  0x7f   : > { %548 = vmatmul.mubr.bf16.gmra.mrb[8].mxu0 %v1178_v33 }
  0x80   : > { %555 = vmatprep.mubr.bf16.mxu0 %v1181_v34 }
  0x87   : > { %556 = vmatmul.mubr.bf16.gmra.mrb[12].mxu0 %v1180_v35 }
  0x88   : > { %563 = vmatprep.mubr.bf16.mxu0 %v1183_v36 }
  0x8f   : > { %564 = vmatmul.mubr.bf16.gmra.mrb[16].mxu0 %v1182_v37 }
  0x90   : > { %571 = vmatprep.mubr.bf16.mxu0 %v1185_v38 }
  0x97   : > { %572 = vmatmul.mubr.bf16.gmra.mrb[20].mxu0 %v1184_v39 }
 0x142   : > { %v1273_v40 = vpop.f32.mrb[0].mxu0 }
 0x143   : > { %v1274_v41 = vpop.f32.mrb[1].mxu0 }
 0x144   : > { %v1884_v42 = vadd.f32 %v1274_v41, %v1273_v40  ;;  %v1276_v43 = vpop.f32.mrb[2].mxu0  ;;  %v1466_v41 = vld [vmem:[#allocation2] sm:$0xff]  }
 0x145   : > { %v1277_v44 = vpop.f32.mrb[3].mxu0 }
 0x146   : > { %v1886_v45 = vadd.f32 %v1277_v44, %v1276_v43  ;;  %v1468_v43 = vld [vmem:[#allocation2 + $0x10] sm:$0xff]   ;;  %v1471_v44 = vld [vmem:[%s2048_s5 + $0x4] ss:$8 sps:$4 sm:$0xff]  }
 0x14a   : > { %v1279_v46 = vpop.f32.mrb[4].mxu0 }
 0x14b   : > { %v1280_v47 = vpop.f32.mrb[5].mxu0 }
 0x14c   : > { %v1888_v48 = vadd.f32 %v1280_v47, %v1279_v46  ;;  %v1282_v49 = vpop.f32.mrb[6].mxu0  ;;  %v1474_v46 = vld [vmem:[%s2048_s5 + $0x14] ss:$8 sps:$4 sm:$0xff]   ;;  %v1472_v47 = vld [vmem:[%s2048_s5 + $0x10] ss:$8 sps:$4 sm:$0xff]  }
 0x14d   : > { %v1283_v50 = vpop.f32.mrb[7].mxu0 }
 0x14e   : > { %v1890_v51 = vadd.f32 %v1283_v50, %v1282_v49  ;;  %v1475_v49 = vld [vmem:[%s2048_s5 + $0x20] ss:$8 sps:$4 sm:$0xff]   ;;  %v1480_v50 = vld [vmem:[%s2048_s5 + $0x34] ss:$8 sps:$4 sm:$0xff]  }
 0x152   : > { %v1285_v52 = vpop.f32.mrb[8].mxu0 }
 0x153   : > { %v1286_v53 = vpop.f32.mrb[9].mxu0 }
 0x154   : > { %v1892_v54 = vadd.f32 %v1286_v53, %v1285_v52  ;;  %v1288_v55 = vpop.f32.mrb[10].mxu0 }
 0x155   : > { %v1289_v56 = vpop.f32.mrb[11].mxu0 }
 0x156   : > { %v1894_v57 = vadd.f32 %v1289_v56, %v1288_v55 }
 0x15a   : > { %v1291_v59 = vpop.f32.mrb[12].mxu0 }
 0x15b   : > { %v1292_v60 = vpop.f32.mrb[13].mxu0 }
 0x15c   : > { %v1293_v61 = vadd.f32 %v1292_v60, %v1291_v59  ;;  %v1294_v62 = vpop.f32.mrb[14].mxu0 }
 0x15d   : > { %v1295_v63 = vpop.f32.mrb[15].mxu0 }
 0x15e   : > { %v1296_v0 = vadd.f32 %v1295_v63, %v1294_v62 }
 0x160   : > { %v1406_v1 = vpack.i.bf16 %v1296_v0, %v1293_v61 }
 0x162   : > { %v1297_v2 = vpop.f32.mrb[16].mxu0  ;;  %1407 = vrot.lane.b32.xlu0 %v1406_v1, %s1640_s11 }
 0x163   : > { %v1298_v3 = vpop.f32.mrb[17].mxu0 }
 0x164   : > { %v1299_v4 = vadd.f32 %v1298_v3, %v1297_v2  ;;  %v1300_v5 = vpop.f32.mrb[18].mxu0 }
 0x165   : > { %v1301_v6 = vpop.f32.mrb[19].mxu0 }
 0x166   : > { %v1302_v7 = vadd.f32 %v1301_v6, %v1300_v5 }
 0x168   : > { %v1411_v8 = vpack.i.bf16 %v1302_v7, %v1299_v4 }
 0x16a   : > { %v1303_v9 = vpop.f32.mrb[20].mxu0  ;;  %1412 = vrot.lane.b32.xlu0 %v1411_v8, %s1640_s11 }
 0x16b   : > { %v1304_v10 = vpop.f32.mrb[21].mxu0 }
 0x16c   : > { %v1305_v11 = vadd.f32 %v1304_v10, %v1303_v9  ;;  %v1306_v12 = vpop.f32.mrb[22].mxu0 }
 0x16d   : > { %v1307_v13 = vpop.f32.mrb[23].mxu0 }
 0x16e   : > { %v1308_v14 = vadd.f32 %v1307_v13, %v1306_v12  ;;  %633 = vperm.xlu0 %1422, %v621_v18  }
 0x170   : > { %v1416_v15 = vpack.i.bf16 %v1308_v14, %v1305_v11 }
 0x172   : > { %1417 = vrot.lane.b32.xlu1 %v1416_v15, %s1640_s11  ;;  %648 = vperm.xlu0 %1422, %v624_v20  }
 0x176   : > { %628 = vperm.xlu1 %1421, %v620_v16  }
 0x17a   : > { %638 = vperm.xlu1 %1421, %v622_v19  }
 0x17e   : > { %643 = vperm.xlu1 %1421, %v623_v21  }
 0x182   : > { %653 = vperm.xlu1 %1421, %v625_v22  }
 0x1d4   : > { %v1408_v23 = vpop.permute.xlu0 %1407 }
 0x1d5   : > { %v1410_v24 = vunpack.i.h.bf16 %v1408_v23  ;;  %v1409_v25 = vunpack.i.l.bf16 %v1408_v23 }
 0x1d7   : > { %v605_v26 = vsel %vm604_vm1, %v1884_v42, %v1409_v25  ;;  %v606_v27 = vsel %vm604_vm1, %v1886_v45, %v1410_v24  ;;  %v1467_v42 = vld [vmem:[#allocation2 + $0x8] sm:$0xff]  }
 0x1d8   : > { %v617_v28 = vpack.c.bf16 %v606_v27, %v605_v26  ;;  %v1469_v45 = vld [vmem:[%s2048_s5] ss:$8 sps:$4 sm:$0xff]  }
 0x1da   : > { %1316 = vmatpush3.bf16.msra.mxu1 %v617_v28 }
 0x1db   : > { %1317 = vmatprep.subr.bf16.mxu1 %v1639_v58 }
 0x1dc   : > { %v1413_v29 = vpop.permute.xlu0 %1412 }
 0x1dd   : > { %v1415_v30 = vunpack.i.h.bf16 %v1413_v29  ;;  %v1414_v31 = vunpack.i.l.bf16 %v1413_v29 }
 0x1df   : > { %v607_v32 = vsel %vm604_vm1, %v1888_v48, %v1414_v31  ;;  %v608_v33 = vsel %vm604_vm1, %v1890_v51, %v1415_v30  ;;  %v1477_v48 = vld [vmem:[%s2048_s5 + $0x24] ss:$8 sps:$4 sm:$0xff]   ;;  %v1478_v51 = vld [vmem:[%s2048_s5 + $0x30] ss:$8 sps:$4 sm:$0xff]  }
 0x1e0   : > { %v618_v34 = vpack.c.bf16 %v608_v33, %v607_v32  ;;  %v780_v30 = vld [vmem:[#allocation5] sm:$0xff]  ;;  %v781_v31 = vld [vmem:[#allocation5 + $0x8] sm:$0xff] }
 0x1e2   : > { %1318 = vmatpush3.bf16.msra.mxu1 %v618_v34 }
 0x1e3   : > { %1319 = vmatprep.subr.bf16.mxu1 %v1639_v58 }
 0x1e4   : > { %v1418_v35 = vpop.permute.xlu1 %1417 }
 0x1e5   : > { %v1420_v36 = vunpack.i.h.bf16 %v1418_v35  ;;  %v1419_v37 = vunpack.i.l.bf16 %v1418_v35 }
 0x1e7   : > { %v609_v38 = vsel %vm604_vm1, %v1892_v54, %v1419_v37  ;;  %v610_v39 = vsel %vm604_vm1, %v1894_v57, %v1420_v36 }
 0x1e8   : > { %v619_v40 = vpack.c.bf16 %v610_v39, %v609_v38 }
 0x1ea   : > { %1320 = vmatpush3.bf16.msra.mxu1 %v619_v40 }
 0x1eb   : > { %888 = vmatprep.subr.bf16.mxu1 %v1471_v44  ;;  %v782_v44 = vld [vmem:[#allocation5 + $0x10] sm:$0xff] }
 0x1ed   : > { %1322 = vmatmul.mubr.msk.bf16.vlgmr.msra.gmra.mrb[0].mxu1 %vm671_vm2, %v1466_v41  ;;  %v634_v56 = vpop.permute.xlu0 %633 }
 0x1ee   : > { %1325 = vmatprep.mubr.msk.bf16.mxu1 %vm1641_vm0, %v1639_v58  ;;  %889 = vmatpush1.bf16.msra.mxu1 %v1469_v45  ;;  %v783_v45 = vld [vmem:[#allocation5 + $0x18] sm:$0xff] }
 0x1ef   : > { %890 = vmatprep.subr.bf16.mxu1 %v1474_v46 }
 0x1f1   : > { %v649_v10 = vpop.permute.xlu0 %648 }
 0x1f2   : > { %891 = vmatpush1.bf16.msra.mxu1 %v1472_v47 }
 0x1f3   : > { %892 = vmatprep.subr.bf16.mxu1 %v1477_v48 }
 0x1f5   : > { %1326 = vmatmul.mubr.msk.bf16.gmra.mrb[4].mxu1 %vm671_vm2, %v1467_v42  ;;  %v629_v52 = vpop.permute.xlu1 %628 }
 0x1f6   : > { %1329 = vmatprep.mubr.msk.bf16.mxu1 %vm1641_vm0, %v1639_v58  ;;  %893 = vmatpush1.bf16.msra.mxu1 %v1475_v49 }
 0x1f7   : > { %894 = vmatprep.subr.bf16.mxu1 %v1480_v50 }
 0x1f9   : > { %v639_v61 = vpop.permute.xlu1 %638 }
 0x1fa   : > { %895 = vmatpush1.bf16.msra.mxu1 %v1478_v51 }
 0x1fd   : > { %1330 = vmatmul.mubr.msk.bf16.gmra.mrb[8].mxu1 %vm671_vm2, %v1468_v43  ;;  %v644_v2 = vpop.permute.xlu1 %643 }
 0x1fe   : > { %920 = vmatprep.mubr.bf16.mxu1 %v1642_v17 }
 0x201   : > { %v654_v15 = vpop.permute.xlu1 %653 }
 0x2c0   : > { %v715_v53 = vpop.f32.mrb[0].mxu1 }
 0x2c1   : > { %v716_v54 = vadd.f32 %v715_v53, %v629_v52  ;;  %v1323_v55 = vpop.f32.mrb[1].mxu1 }
 0x2c2   : > { %v718_v57 = vpop.f32.mrb[2].mxu1  ;;  %v785_v55 = vld [vmem:[#allocation5 + $0x28] sm:$0xff] }
 0x2c3   : > { %v1208_v58 = vmul.f32 -1.442695, %v716_v54  ;;  %v719_v59 = vadd.f32 %v718_v57, %v634_v56  ;;  %v1324_v60 = vpop.f32.mrb[3].mxu1 }
 0x2c5   : > { %1481 = vpow2.f32 %v1208_v58  ;;  %v1209_v62 = vmul.f32 -1.442695, %v719_v59 }
 0x2c7   : > { %1483 = vpow2.f32 %v1209_v62 }
 0x2c8   : > { %v723_v63 = vpop.f32.mrb[4].mxu1 }
 0x2c9   : > { %v724_v0 = vadd.f32 %v723_v63, %v639_v61  ;;  %v1327_v1 = vpop.f32.mrb[5].mxu1 }
 0x2ca   : > { %v726_v3 = vpop.f32.mrb[6].mxu1 }
 0x2cb   : > { %v1210_v4 = vmul.f32 -1.442695, %v724_v0  ;;  %v727_v5 = vadd.f32 %v726_v3, %v644_v2  ;;  %v1328_v6 = vpop.f32.mrb[7].mxu1 }
 0x2cd   : > { %1485 = vpow2.f32 %v1210_v4  ;;  %v1211_v7 = vmul.f32 -1.442695, %v727_v5 }
 0x2cf   : > { %v1482_v8 = vpop.eup %1481  ;;  %1487 = vpow2.f32 %v1211_v7 }
 0x2d0   : > { %v756_v9 = vadd.f32 1.0, %v1482_v8  ;;  %v731_v11 = vpop.f32.mrb[8].mxu1 }
 0x2d1   : > { %v1484_v12 = vpop.eup %1483  ;;  %v732_v13 = vadd.f32 %v731_v11, %v649_v10  ;;  %v1331_v14 = vpop.f32.mrb[9].mxu1 }
 0x2d2   : > { %1489 = vrcp.f32 %v756_v9  ;;  %v757_v16 = vadd.f32 1.0, %v1484_v12  ;;  %v734_v18 = vpop.f32.mrb[10].mxu1 }
 0x2d3   : > { %v1212_v19 = vmul.f32 -1.442695, %v732_v13  ;;  %v735_v20 = vadd.f32 %v734_v18, %v654_v15  ;;  %v1332_v21 = vpop.f32.mrb[11].mxu1 }
 0x2d4   : > { %1491 = vrcp.f32 %v757_v16 }
 0x2d5   : > { %1493 = vpow2.f32 %v1212_v19  ;;  %v1213_v22 = vmul.f32 -1.442695, %v735_v20 }
 0x2d7   : > { %v1486_v23 = vpop.eup %1485  ;;  %1495 = vpow2.f32 %v1213_v22 }
 0x2d8   : > { %v758_v24 = vadd.f32 1.0, %v1486_v23 }
 0x2d9   : > { %v1488_v25 = vpop.eup %1487 }
 0x2da   : > { %1497 = vrcp.f32 %v758_v24  ;;  %v759_v26 = vadd.f32 1.0, %v1488_v25 }
 0x2dc   : > { %v1490_v27 = vpop.eup %1489  ;;  %1499 = vrcp.f32 %v759_v26 }
 0x2dd   : > { %v774_v28 = vmul.f32 %v1490_v27, %v716_v54  ;;  %v784_v54 = vld [vmem:[#allocation5 + $0x20] sm:$0xff] }
 0x2de   : > { %v1492_v29 = vpop.eup %1491 }
 0x2df   : > { %v1494_v32 = vpop.eup %1493  ;;  %v775_v33 = vmul.f32 %v1492_v29, %v719_v59  ;;  %v786_v36 = vmul.f32 %v780_v30, %v774_v28 }
 0x2e0   : > { %v760_v34 = vadd.f32 1.0, %v1494_v32 }
 0x2e1   : > { %v1496_v35 = vpop.eup %1495  ;;  %v787_v37 = vmul.f32 %v781_v31, %v775_v33 }
 0x2e2   : > { %1501 = vrcp.f32 %v760_v34  ;;  %v761_v38 = vadd.f32 1.0, %v1496_v35 }
 0x2e3   : > { %v816_v39 = vpack.c.bf16 %v787_v37, %v786_v36  ;;  %v1423_v40 = vpack.i.bf16 %v787_v37, %v786_v36 }
 0x2e4   : > { %v1498_v41 = vpop.eup %1497  ;;  %1503 = vrcp.f32 %v761_v38 }
 0x2e5   : > { %v776_v42 = vmul.f32 %v1498_v41, %v724_v0  ;;  %1424 = vrot.lane.b32.xlu0 %v1423_v40, %s1640_s11  ;;  %1222 = vmatmul.mubr.msk.bf16.vlgmr.msra.gmra.mrb[12].mxu1 %vm604_vm1, %v816_v39 }
 0x2e6   : > { %v1500_v43 = vpop.eup %1499  ;;  %930 = vmatprep.mubr.bf16.mxu1 %v1642_v17 }
 0x2e7   : > { %v777_v46 = vmul.f32 %v1500_v43, %v727_v5  ;;  %v788_v47 = vmul.f32 %v782_v44, %v776_v42 }
 0x2e9   : > { %v789_v48 = vmul.f32 %v783_v45, %v777_v46 }
 0x2eb   : > { %v817_v49 = vpack.c.bf16 %v789_v48, %v788_v47  ;;  %v1428_v50 = vpack.i.bf16 %v789_v48, %v788_v47 }
 0x2ec   : > { %v1502_v51 = vpop.eup %1501 }
 0x2ed   : > { %v778_v52 = vmul.f32 %v1502_v51, %v732_v13  ;;  %1429 = vrot.lane.b32.xlu1 %v1428_v50, %s1640_s11  ;;  %1223 = vmatmul.mubr.msk.bf16.gmra.mrb[16].mxu1 %vm604_vm1, %v817_v49 }
 0x2ee   : > { %v1504_v53 = vpop.eup %1503  ;;  %940 = vmatprep.mubr.bf16.mxu1 %v1642_v17 }
 0x2ef   : > { %v779_v56 = vmul.f32 %v1504_v53, %v735_v20  ;;  %v790_v57 = vmul.f32 %v784_v54, %v778_v52 }
 0x2f1   : > { %v791_v58 = vmul.f32 %v785_v55, %v779_v56 }
 0x2f3   : > { %v818_v59 = vpack.c.bf16 %v791_v58, %v790_v57  ;;  %v1433_v60 = vpack.i.bf16 %v791_v58, %v790_v57 }
 0x2f5   : > { %1434 = vrot.lane.b32.xlu0 %v1433_v60, %s1640_s11  ;;  %1224 = vmatmul.mubr.msk.bf16.gmra.mrb[20].mxu1 %vm604_vm1, %v818_v59  ;;  %s1335_s11 = smul.u32 3072, %s1702_s25  ;;  %s2002_s25 = scalar_lea.sflag [#allocation4], %s275_s16 }
 0x2f6   : > { %950 = vmatprep.mubr.bf16.mxu1 %v1642_v17 }
 0x2f7   : > { %s1994_s20 = scalar_lea.hbm %s2049_s6, %s1335_s11 }
 0x357   : > { %v1425_v61 = vpop.permute.xlu0 %1424 }
 0x358   : > { %v1427_v62 = vunpack.i.h.bf16 %v1425_v61  ;;  %v1426_v63 = vunpack.i.l.bf16 %v1425_v61 }
 0x35a   : > { %v819_v0 = vpack.c.bf16 %v1427_v62, %v1426_v63 }
 0x35c   : > { %1225 = vmatmul.mubr.msk.bf16.gmra.mrb[24].mxu1 %vm604_vm1, %v819_v0 }
 0x35d   : > { %960 = vmatprep.mubr.bf16.mxu1 %v1642_v17 }
 0x35f   : > { %v1430_v1 = vpop.permute.xlu1 %1429 }
 0x360   : > { %v1432_v2 = vunpack.i.h.bf16 %v1430_v1  ;;  %v1431_v3 = vunpack.i.l.bf16 %v1430_v1 }
 0x362   : > { %v820_v4 = vpack.c.bf16 %v1432_v2, %v1431_v3 }
 0x364   : > { %1226 = vmatmul.mubr.msk.bf16.gmra.mrb[28].mxu1 %vm604_vm1, %v820_v4 }
 0x365   : > { %970 = vmatprep.mubr.bf16.mxu1 %v1642_v17 }
 0x367   : > { %v1435_v5 = vpop.permute.xlu0 %1434 }
 0x368   : > { %v1437_v6 = vunpack.i.h.bf16 %v1435_v5  ;;  %v1436_v7 = vunpack.i.l.bf16 %v1435_v5 }
 0x36a   : > { %v821_v8 = vpack.c.bf16 %v1437_v6, %v1436_v7 }
 0x36c   : > { %1227 = vmatmul.mubr.msk.bf16.gmra.mrb[32].mxu1 %vm604_vm1, %v821_v8 }
 0x3b8   : > { %v922_v9 = vpop.f32.mrb[12].mxu1 }
 0x3b9   : > { %v924_v10 = vpop.f32.mrb[13].mxu1 }
 0x3ba   : > { %v1245_v11 = vpack.c.bf16 %v924_v10, %v922_v9  ;;  %v926_v12 = vpop.f32.mrb[14].mxu1 }
 0x3bb   : > { %v928_v13 = vpop.f32.mrb[15].mxu1 }
 0x3bc   : > { %1053 = vst [vmem:[%s1849_s9 + $0x30] sm:$0xff] %v1245_v11  ;;  %v1246_v14 = vpack.c.bf16 %v928_v13, %v926_v12 }
 0x3be   : > { %1054 = vst [vmem:[%s1849_s9 + $0x38] sm:$0xff] %v1246_v14 }
 0x3c0   : > { %v932_v15 = vpop.f32.mrb[16].mxu1 }
 0x3c1   : > { %v934_v17 = vpop.f32.mrb[17].mxu1 }
 0x3c2   : > { %v1247_v16 = vpack.c.bf16 %v934_v17, %v932_v15  ;;  %v936_v18 = vpop.f32.mrb[18].mxu1 }
 0x3c3   : > { %v938_v19 = vpop.f32.mrb[19].mxu1 }
 0x3c4   : > { %1055 = vst [vmem:[%s1849_s9 + $0x40] sm:$0xff] %v1247_v16  ;;  %v1248_v20 = vpack.c.bf16 %v938_v19, %v936_v18 }
 0x3c6   : > { %1056 = vst [vmem:[%s1849_s9 + $0x48] sm:$0xff] %v1248_v20 }
 0x3c8   : > { %v942_v21 = vpop.f32.mrb[20].mxu1 }
 0x3c9   : > { %v944_v22 = vpop.f32.mrb[21].mxu1 }
 0x3ca   : > { %v1249_v23 = vpack.c.bf16 %v944_v22, %v942_v21  ;;  %v946_v24 = vpop.f32.mrb[22].mxu1 }
 0x3cb   : > { %v948_v25 = vpop.f32.mrb[23].mxu1 }
 0x3cc   : > { %1057 = vst [vmem:[%s1849_s9 + $0x50] sm:$0xff] %v1249_v23  ;;  %v1250_v26 = vpack.c.bf16 %v948_v25, %v946_v24 }
 0x3ce   : > { %1058 = vst [vmem:[%s1849_s9 + $0x58] sm:$0xff] %v1250_v26 }
 0x42f   : > { %v952_v27 = vpop.f32.mrb[24].mxu1 }
 0x430   : > { %v954_v28 = vpop.f32.mrb[25].mxu1 }
 0x431   : > { %v1251_v29 = vpack.c.bf16 %v954_v28, %v952_v27  ;;  %v956_v30 = vpop.f32.mrb[26].mxu1 }
 0x432   : > { %v958_v31 = vpop.f32.mrb[27].mxu1 }
 0x433   : > { %1059 = vst [vmem:[%s1849_s9 + $0x90] sm:$0xff] %v1251_v29  ;;  %v1252_v32 = vpack.c.bf16 %v958_v31, %v956_v30 }
 0x435   : > { %1060 = vst [vmem:[%s1849_s9 + $0x98] sm:$0xff] %v1252_v32 }
 0x437   : > { %v962_v33 = vpop.f32.mrb[28].mxu1 }
 0x438   : > { %v964_v34 = vpop.f32.mrb[29].mxu1 }
 0x439   : > { %v1253_v35 = vpack.c.bf16 %v964_v34, %v962_v33  ;;  %v966_v36 = vpop.f32.mrb[30].mxu1 }
 0x43a   : > { %v968_v37 = vpop.f32.mrb[31].mxu1 }
 0x43b   : > { %1061 = vst [vmem:[%s1849_s9 + $0xa0] sm:$0xff] %v1253_v35  ;;  %v1254_v38 = vpack.c.bf16 %v968_v37, %v966_v36 }
 0x43d   : > { %1062 = vst [vmem:[%s1849_s9 + $0xa8] sm:$0xff] %v1254_v38 }
 0x43f   : > { %v972_v39 = vpop.f32.mrb[32].mxu1 }
 0x440   : > { %v974_v40 = vpop.f32.mrb[33].mxu1 }
 0x441   : > { %v1255_v41 = vpack.c.bf16 %v974_v40, %v972_v39  ;;  %v976_v42 = vpop.f32.mrb[34].mxu1 }
 0x442   : > { %v978_v43 = vpop.f32.mrb[35].mxu1 }
 0x443   : > { %1063 = vst [vmem:[%s1849_s9 + $0xb0] sm:$0xff] %v1255_v41  ;;  %v1256_v44 = vpack.c.bf16 %v978_v43, %v976_v42 }
 0x445   : > { %1064 = vst [vmem:[%s1849_s9 + $0xb8] sm:$0xff] %v1256_v44 }
 0x446   : > { %1574 = shalt.err (!%p1571_p11)
}
 0x447   : > { %s1575_s16 = scalar_lea.hbm %s1994_s20, 3072  ;;  %s1579_s13 = scalar_lea.hbm %s2049_s6, 6144 }
 0x448   : > { %p1576_p13 = scmp.ne.s32.totalorder %s1994_s20, %s1575_s16  ;;  %p1580_p6 = scmp.lt.u32.totalorder %s1994_s20, %s2049_s6 }
 0x449   : > { %p1581_p9 = scmp.lt.u32.totalorder %s1579_s13, %s1575_s16  ;;  %p1583_p10 = scmp.lt.u32.totalorder %s1575_s16, %s1994_s20 }
 0x44a   : > { %p1577_p0 = pnand %p1576_p13, %p2062_p1 }
 0x44b   : > { %p1582_p12 = por %p1581_p9, %p1580_p6 }
 0x44c   : > { %p1578_p5 = pneg %p1577_p0 }
 0x44d   : > { %p1584_p2 = por %p1583_p10, %p1582_p12 }
 0x44f   : > { %p1585_p3 = pnand %p1584_p2, %p1578_p5 }
 0x451   : > { %1588 = shalt.err (!%p1585_p3)
}
 0x452   : > { %s1644_s11 = smov 128   ;;  %s1645_s18 = smov 8  }
 0x453   : > { %1344 = dma.vmem_to_hbm [thread:$0]  (%p2062_p1), %s1996_s17, 3072, %s1994_s20, %s2002_s25, %s1644_s11, %s1644_s11, %s1645_s18  }
 0x454 PF: > { %p1361_p4 = scmp.ge.s32.totalorder %s1631_s24, 2  ;;  %s1095_s19 = sand.u32 1, %s1619_s21  }
 0x455   : > { %p2063_p7 = scmp.ne.s32.totalorder %s2054_s8, 0  ;;  %s1096_s26 = scalar_lea.sflag [#allocation4], %s1095_s19 }
 0x457   : > { %p1354_p8 = pnand %p1361_p4, %p2063_p7 }
 0x459   : > { %1614 = dma.done.wait (!%p1354_p8), %s1096_s26, 3072  }
 0x45a   : > { %1616 = vsyncadd (!%p1354_p8), %s1096_s26, 4294964224  ;;  %p18_p11 = scmp.ge.s32.totalorder %s1706_s27, 4   ;;  %s2064_s21 = smov %s1623_s22 }
 0x45b   : > { %s2065_s22 = smov %s1627_s23  ;;  %s2066_s23 = smov %s1717_s30 }
 0x45c   : > { %s2067_s24 = smov %s1706_s27  ;;  %20 = sbr.rel (!%p18_p11) target bundleno = 5 (0x5), region = 88 }
 0x463   :  { %1101 = vsyncpa [#allocation3], 1 }
 0x464   :  { %1103 = vsyncpa [#allocation3 + $0x1], 1 }
 0x465   :  { %1104 = vsyncpa [#allocation6], 1 }
 0x466   :  { %1105 = vsyncpa [#allocation4], 1 }
 0x467   :  { %1107 = vsyncpa [#allocation4 + $0x1], 1 }

// kernel: tpu_custom_call.1
= control target key start
LH: loop header
LB: loop body
LE: loop exit
PB: predicated region body
PF: predicated region fallthrough
CT: control target
= control target key end

     0   :  { %11 = vsyncpa [#allocation3], 0  ;;  %s2043_s0 = inlined_call_operand.vmem [shape: bf16[4,48,256], index: 0, kind: input, shape index: {}]   ;;  %s2044_s1 = inlined_call_operand.vmem [shape: bf16[256,64], index: 1, kind: input, shape index: {}]   ;;  %s2045_s2 = inlined_call_operand.hbm [shape: bf16[48,48], index: 2, kind: input, shape index: {}]   ;;  %s2046_s3 = inlined_call_operand.vmem [shape: f32[48,1], index: 3, kind: input, shape index: {}]   ;;  %s2047_s4 = inlined_call_operand.hbm [shape: f32[48,128], index: 4, kind: input, shape index: {}]   ;;  %s2048_s5 = inlined_call_operand.vmem [shape: bf16[64,256], index: 5, kind: input, shape index: {}]   ;;  %s2049_s6 = inlined_call_operand.hbm [shape: bf16[4,96,256], index: 6, kind: output, shape index: {}]  }
   0x1   :  { %12 = vsyncpa [#allocation6], 0 }
   0x2   :  { %13 = vsyncpa [#allocation4], 0 }
   0x3   :  { %15 = vsyncpa [#allocation4 + $0x1], 0  ;;  %s1681_s21 = smov 0   ;;  %s1683_s22 = smov 0  }
   0x4   :  { %s1685_s23 = smov 0   ;;  %s1687_s24 = smov 0  }
   0x5 LB: > { %s1702_s25 = sadd.s32 4294967295, %s1631_s24   ;;  %s1164_s26 = sadd.s32 4294967294, %s1631_s24   ;;  %s1631_s24 = sphi %s1687_s24, %s2067_s24   ;;  %s1627_s23 = sphi %s1685_s23, %s2066_s23   ;;  %s1623_s22 = sphi %s1683_s22, %s2065_s22   ;;  %s1619_s21 = sphi %s1681_s21, %s2064_s21  }
   0x6   : > { %s1706_s27 = sadd.s32 1, %s1631_s24   ;;  %s159_s28 = sadd.s32 1, %s1627_s23 }
   0x7   : > { %s156_s29 = ssub.s32 %s1631_s24, %s1706_s27  ;;  %p169_p0 = scmp.ne.s32.totalorder %s1627_s23, %s1623_s22 }
   0x8   : > { %p157_p1 = scmp.eq.s32.totalorder %s156_s29, 0  ;;  %p170_p2 = scmp.eq.s32.totalorder %s1702_s25, 1 }
   0x9   : > { %p175_p3 = scmp.ne.s32.totalorder %s1623_s22, %s1619_s21  ;;  %p176_p4 = scmp.eq.s32.totalorder %s1164_s26, 1 }
   0xa   : > { %s1717_s30 = scalar_select %p157_p1, %s1627_s23, %s159_s28  }
   0xb   : > { %p1719_p5 = por %p170_p2, %p169_p0  ;;  %p1723_p6 = por %p176_p4, %p175_p3 }
   0xc   : > { %p1165_p7 = scmp.ge.s32.totalorder %s1631_s24, 1  ;;  %p183_p8 = scmp.lt.s32.totalorder %s1631_s24, 3 }
   0xd   : > { %s2053_s7 = scalar_select %p1719_p5, 1, 0 }
   0xe   : > { %s2054_s8 = scalar_select %p1723_p6, 1, 0 }
   0xf   : > { %p2050_p9 = scmp.eq.s32.totalorder %s1702_s25, 0  ;;  %p1730_p10 = pnand %p1165_p7, %p183_p8 }
  0x10   : > { %s1633_s10 = smov [#allocation2]   ;;  %s1634_s13 = smov [#allocation5]  }
  0x11   : > { %s2055_s9 = scalar_select %p1730_p10, 1, 0 }
  0x12   : > { %s198_s11 = sshll.u32 %s1633_s10, 4  ;;  %p1346_p11 = pneg %p1730_p10  ;;  %s199_s11 = int_to_ptr.vmem [resolvable:$true] %s198_s11 }
  0x13   : > { %s214_s14 = sshll.u32 %s1634_s13, 4  ;;  %s1505_s17 = scalar_lea.hbm %s2045_s2, 384  ;;  %s1742_s14 = int_to_ptr.vmem [resolvable:$true] %s214_s14 }
  0x14   : > { %p1738_p12 = pnand %p2050_p9, %p1346_p11  ;;  %p1506_p13 = scmp.ne.s32.totalorder %s2045_s2, %s1505_s17 }
  0x15   : > { %p1512_p3 = scmp.lt.u32.totalorder %s1505_s17, %s2045_s2 }
  0x16   : > { %p1507_p0 = pneg %p1738_p12 }
  0x18   : > { %p1508_p1 = pnand %p1507_p0, %p1506_p13 }
  0x1a   : > { %p1509_p2 = pneg %p1508_p1 }
  0x1c   : > { %p1514_p4 = pnand %p1512_p3, %p1509_p2 }
  0x1e   : > { %1517 = shalt.err (!%p1514_p4)
}
  0x1f   : > { %s1518_s28 = scalar_lea.vmem %s199_s11, 384  ;;  %p1526_p9 = scmp.lt.s32.totalorder %s199_s11, %s199_s11 }
  0x20   : > { %p1519_p7 = scmp.ne.s32.totalorder %s199_s11, %s1518_s28  ;;  %p1527_p6 = scmp.lt.s32.totalorder %s1518_s28, %s1518_s28 }
  0x22   : > { %p1521_p8 = pnand %p1519_p7, %p1507_p0  ;;  %p1528_p5 = por %p1527_p6, %p1526_p9 }
  0x24   : > { %p1522_p11 = pneg %p1521_p8 }
  0x26   : > { %p1529_p10 = pnand %p1528_p5, %p1522_p11 }
  0x28   : > { %1532 = shalt.err (!%p1529_p10)
}
  0x29   : > { %s1635_s29 = smov 64   ;;  %s1636_s10 = smov 4  }
  0x2a   : > { %1349 = dma.hbm_to_vmem [thread:$0]  (!%p1738_p12), %s2045_s2, 384, %s199_s11, [#allocation3], %s1635_s29, %s1635_s29, %s1636_s10  }
  0x2b   : > { %s1533_s18 = scalar_lea.hbm %s2047_s4, 768 }
  0x2c   : > { %p1534_p13 = scmp.ne.s32.totalorder %s2047_s4, %s1533_s18  ;;  %p1540_p9 = scmp.lt.u32.totalorder %s1533_s18, %s2047_s4 }
  0x2e   : > { %p1536_p5 = pnand %p1534_p13, %p1507_p0 }
  0x30   : > { %p1537_p6 = pneg %p1536_p5 }
  0x32   : > { %p1542_p10 = pnand %p1540_p9, %p1537_p6 }
  0x34   : > { %1545 = shalt.err (!%p1542_p10)
}
  0x35   : > { %s1546_s11 = scalar_lea.vmem %s1742_s14, 768  ;;  %p1554_p4 = scmp.lt.s32.totalorder %s1742_s14, %s1742_s14 }
  0x36   : > { %p1547_p1 = scmp.ne.s32.totalorder %s1742_s14, %s1546_s11  ;;  %p1555_p7 = scmp.lt.s32.totalorder %s1546_s11, %s1546_s11 }
  0x38   : > { %p1549_p2 = pnand %p1547_p1, %p1507_p0  ;;  %p1556_p8 = por %p1555_p7, %p1554_p4 }
  0x3a   : > { %p1550_p3 = pneg %p1549_p2 }
  0x3c   : > { %p1557_p11 = pnand %p1556_p8, %p1550_p3 }
  0x3e   : > { %1560 = shalt.err (!%p1557_p11)
}
  0x3f   : > { %s1637_s29 = smov 128   ;;  %s1638_s10 = smov 8  }
  0x40   : > { %1352 = dma.hbm_to_vmem [thread:$0]  (!%p1738_p12), %s2047_s4, 768, %s1742_s14, [#allocation6], %s1637_s29, %s1637_s29, %s1638_s10  }
  0x41   : > { %p2057_p13 = scmp.ne.s32.totalorder %s2055_s9, 0 }
  0x42   : > { %p2058_p0 = scmp.eq.s32.totalorder (!%p2057_p13), %s1702_s25, 0 }
  0x43   : > { %243 = sbr.rel (%p2057_p13) target bundleno = 1108 (0x454), region = 44 }
  0x4a   : > { %1606 = dma.done.wait (%p2058_p0), [#allocation3], 384   ;;  %p2059_p5 = pmov %p2058_p0 }
  0x4b   : > { %p2060_p6 = pmov %p2058_p0 }
  0x4c   : > { %1608 = vsyncadd (%p2059_p5), [#allocation3], 4294966912 }
  0x4d   : > { %1610 = dma.done.wait (%p2060_p6), [#allocation6], 768   ;;  %p2061_p9 = pmov %p2058_p0 }
  0x4e   : > { %s1172_s12 = sshll.u32 %s1702_s25, 1  ;;  %v1438_v0 = vld [vmem:[%s2044_s1 + $0x40] sm:$0xff]   ;;  %v1440_v2 = vld [vmem:[%s2044_s1 + $0x48] sm:$0xff]   ;;  %v1442_v4 = vld [vmem:[%s2044_s1 + $0x50] sm:$0xff]   ;;  %s275_s16 = sand.u32 1, %s1623_s22   ;;  %v1639_v58 = vmov 0.0  }
  0x4f   : > { %1612 = vsyncadd (%p2061_p9), [#allocation6], 4294966528  ;;  %v1439_v1 = vld [vmem:[%s2044_s1] sm:$0xff]   ;;  %p279_p12 = scmp.lt.s32.totalorder %s1172_s12, 3  ;;  %1257 = vmatprep.subr.bf16.mxu0 %v1438_v0  ;;  %v1441_v3 = vld [vmem:[%s2044_s1 + $0x8] sm:$0xff]   ;;  %s1333_s20 = smul.u32 192, %s275_s16  ;;  %1315 = vmatprep.subr.bf16.mxu1 %v1639_v58 }
  0x50   : > { %1258 = vmatpush3.bf16.msra.mxu0 %v1439_v1  ;;  %v1443_v5 = vld [vmem:[%s2044_s1 + $0x10] sm:$0xff]   ;;  %v1444_v6 = vld [vmem:[%s2044_s1 + $0x58] sm:$0xff]   ;;  %v1446_v8 = vld [vmem:[%s2044_s1 + $0x60] sm:$0xff]   ;;  %vm1641_vm0 = vmmov 0   ;;  %vm604_vm1 = vcmask 523264   ;;  %vm671_vm2 = vcmask 392192  }
  0x51   : > { %1259 = vmatprep.subr.bf16.mxu0 %v1440_v2  ;;  %s2069_s12 = smov (!%p279_p12, %s1172_s12), 3  ;;  %v1445_v7 = vld [vmem:[%s2044_s1 + $0x18] sm:$0xff]   ;;  %v1447_v9 = vld [vmem:[%s2044_s1 + $0x20] sm:$0xff]   ;;  %v1448_v10 = vld [vmem:[%s2044_s1 + $0x68] sm:$0xff]   ;;  %s1849_s9 = scalar_lea.vmem [#allocation7], %s1333_s20  ;;  %1321 = vmatprep.mubr.msk.bf16.mxu1 %vm1641_vm0, %v1639_v58 }
  0x52   : > { %s1334_s14 = smul.u32 48, %s2069_s12  ;;  %v1449_v14 = vld [vmem:[%s2044_s1 + $0x28] sm:$0xff]   ;;  %v1450_v19 = vld [vmem:[%s2044_s1 + $0x70] sm:$0xff]   ;;  %v1452_v27 = vld [vmem:[%s2044_s1 + $0x78] sm:$0xff]   ;;  %s1080_s17 = sshll.u32 %s1849_s9, 4  ;;  %s1996_s17 = int_to_ptr.vmem [resolvable:$true] %s1080_s17 }
  0x53   : > { %v1451_v26 = vld [vmem:[%s2044_s1 + $0x30] sm:$0xff]   ;;  %v1453_v28 = vld [vmem:[%s2044_s1 + $0x38] sm:$0xff]   ;;  %s1561_s26 = scalar_lea.vmem %s1996_s17, 3072  ;;  %p2062_p1 = scmp.ne.s32.totalorder %s2053_s7, 0 }
  0x54   : > { %1260 = vmatpush3.bf16.msra.mxu0 %v1441_v3  ;;  %s1835_s11 = scalar_lea.vmem %s2043_s0, %s1334_s14  ;;  %p1562_p10 = scmp.ne.s32.totalorder %s1996_s17, %s1561_s26 }
  0x55   : > { %1261 = vmatprep.subr.bf16.mxu0 %v1442_v4  ;;  %v287_v11 = vld [vmem:[%s1835_s11] sm:$0xff]  ;;  %v288_v12 = vld [vmem:[%s1835_s11 + $0x8] sm:$0xff]  ;;  %v289_v13 = vld [vmem:[%s1835_s11 + $0x10] sm:$0xff]  ;;  %s1643_s28 = smov [#allocation7]  }
  0x56   : > { %299 = vst [vmem:[%s1849_s9] sm:$0xff] %v287_v11  ;;  %300 = vst [vmem:[%s1849_s9 + $0x8] sm:$0xff] %v288_v12  ;;  %v1175_v15 = vcombine.high %v287_v11, %v288_v12  ;;  %v290_v16 = vld [vmem:[%s1835_s11 + $0x18] sm:$0xff]  ;;  %v291_v17 = vld [vmem:[%s1835_s11 + $0x20] sm:$0xff]  ;;  %v1174_v29 = vcombine.low %v287_v11, %v288_v12  ;;  %p1563_p2 = pnand %p1562_p10, %p2062_p1  ;;  %s1565_s29 = sshll.u32 %s1643_s28, 4  ;;  %s1566_s29 = int_to_ptr.vmem [resolvable:$false] %s1565_s29 }
  0x57   : > { %301 = vst [vmem:[%s1849_s9 + $0x10] sm:$0xff] %v289_v13  ;;  %v292_v18 = vld [vmem:[%s1835_s11 + $0x28] sm:$0xff]  ;;  %302 = vst [vmem:[%s1849_s9 + $0x18] sm:$0xff] %v290_v16  ;;  %v293_v20 = vld [vmem:[%s1835_s11 + $0x30] sm:$0xff]  ;;  %v1177_v30 = vcombine.high %v289_v13, %v290_v16  ;;  %v1176_v31 = vcombine.low %v289_v13, %v290_v16  ;;  %s1567_s10 = scalar_lea.vmem %s1566_s29, 6144  ;;  %p1568_p4 = scmp.lt.s32.totalorder %s1996_s17, %s1566_s29 }
  0x58   : > { %1262 = vmatpush3.bf16.msra.mxu0 %v1443_v5  ;;  %303 = vst [vmem:[%s1849_s9 + $0x20] sm:$0xff] %v291_v17  ;;  %304 = vst [vmem:[%s1849_s9 + $0x28] sm:$0xff] %v292_v18  ;;  %v294_v21 = vld [vmem:[%s1835_s11 + $0x38] sm:$0xff]  ;;  %v295_v22 = vld [vmem:[%s1835_s11 + $0x40] sm:$0xff]  ;;  %531 = vmatprep.mubr.bf16.mxu0 %v1175_v15  ;;  %v1179_v32 = vcombine.high %v291_v17, %v292_v18  ;;  %v1178_v33 = vcombine.low %v291_v17, %v292_v18  ;;  %v1642_v17 = vmov 0   ;;  %p1564_p3 = pneg %p1563_p2  ;;  %p1569_p7 = scmp.lt.s32.totalorder %s1567_s10, %s1561_s26 }
  0x59   : > { %1263 = vmatprep.subr.bf16.mxu0 %v1444_v6  ;;  %305 = vst [vmem:[%s1849_s9 + $0x60] sm:$0xff] %v293_v20  ;;  %306 = vst [vmem:[%s1849_s9 + $0x68] sm:$0xff] %v294_v21  ;;  %v296_v23 = vld [vmem:[%s1835_s11 + $0x48] sm:$0xff]  ;;  %v297_v24 = vld [vmem:[%s1835_s11 + $0x50] sm:$0xff]  ;;  %v1181_v34 = vcombine.high %v293_v20, %v294_v21  ;;  %v1180_v35 = vcombine.low %v293_v20, %v294_v21  ;;  %1421 = vset.pattern.permute.xlu1 %v1642_v17 }
  0x5a   : > { %307 = vst [vmem:[%s1849_s9 + $0x70] sm:$0xff] %v295_v22  ;;  %v298_v25 = vld [vmem:[%s1835_s11 + $0x58] sm:$0xff]  ;;  %308 = vst [vmem:[%s1849_s9 + $0x78] sm:$0xff] %v296_v23  ;;  %v1183_v36 = vcombine.high %v295_v22, %v296_v23  ;;  %v1182_v37 = vcombine.low %v295_v22, %v296_v23  ;;  %s1640_s11 = smov 64   ;;  %v620_v16 = vld [vmem:[%s2046_s3] sm:$0xff]  ;;  %1422 = vset.pattern.permute.xlu0 %v1642_v17  ;;  %p1570_p8 = por %p1569_p7, %p1568_p4 }
  0x5b   : > { %309 = vst [vmem:[%s1849_s9 + $0x80] sm:$0xff] %v297_v24  ;;  %310 = vst [vmem:[%s1849_s9 + $0x88] sm:$0xff] %v298_v25  ;;  %v1185_v38 = vcombine.high %v297_v24, %v298_v25  ;;  %v1184_v39 = vcombine.low %v297_v24, %v298_v25  ;;  %v621_v18 = vld [vmem:[%s2046_s3 + $0x8] sm:$0xff]  ;;  %v624_v20 = vld [vmem:[%s2046_s3 + $0x20] sm:$0xff] }
  0x5c   : > { %1264 = vmatpush3.bf16.msra.mxu0 %v1445_v7  ;;  %v623_v21 = vld [vmem:[%s2046_s3 + $0x18] sm:$0xff]  ;;  %v625_v22 = vld [vmem:[%s2046_s3 + $0x28] sm:$0xff]  ;;  %p1571_p11 = pnand %p1570_p8, %p1564_p3 }
  0x5d   : > { %1265 = vmatprep.subr.bf16.mxu0 %v1446_v8 }
  0x60   : > { %1266 = vmatpush3.bf16.msra.mxu0 %v1447_v9 }
  0x61   : > { %1267 = vmatprep.subr.bf16.mxu0 %v1448_v10 }
  0x64   : > { %1268 = vmatpush3.bf16.msra.mxu0 %v1449_v14 }
  0x65   : > { %1269 = vmatprep.subr.bf16.mxu0 %v1450_v19  ;;  %v622_v19 = vld [vmem:[%s2046_s3 + $0x10] sm:$0xff] }
  0x68   : > { %1270 = vmatpush3.bf16.msra.mxu0 %v1451_v26 }
  0x69   : > { %1271 = vmatprep.subr.bf16.mxu0 %v1452_v27 }
  0x6c   : > { %1272 = vmatpush3.bf16.msra.mxu0 %v1453_v28 }
  0x6f   : > { %532 = vmatmul.mubr.bf16.vlgmr.msra.gmra.mrb[0].mxu0 %v1174_v29 }
  0x70   : > { %539 = vmatprep.mubr.bf16.mxu0 %v1177_v30 }
  0x77   : > { %540 = vmatmul.mubr.bf16.gmra.mrb[4].mxu0 %v1176_v31 }
  0x78   : > { %547 = vmatprep.mubr.bf16.mxu0 %v1179_v32 }
  0x7f   : > { %548 = vmatmul.mubr.bf16.gmra.mrb[8].mxu0 %v1178_v33 }
  0x80   : > { %555 = vmatprep.mubr.bf16.mxu0 %v1181_v34 }
  0x87   : > { %556 = vmatmul.mubr.bf16.gmra.mrb[12].mxu0 %v1180_v35 }
  0x88   : > { %563 = vmatprep.mubr.bf16.mxu0 %v1183_v36 }
  0x8f   : > { %564 = vmatmul.mubr.bf16.gmra.mrb[16].mxu0 %v1182_v37 }
  0x90   : > { %571 = vmatprep.mubr.bf16.mxu0 %v1185_v38 }
  0x97   : > { %572 = vmatmul.mubr.bf16.gmra.mrb[20].mxu0 %v1184_v39 }
 0x142   : > { %v1273_v40 = vpop.f32.mrb[0].mxu0 }
 0x143   : > { %v1274_v41 = vpop.f32.mrb[1].mxu0 }
 0x144   : > { %v1884_v42 = vadd.f32 %v1274_v41, %v1273_v40  ;;  %v1276_v43 = vpop.f32.mrb[2].mxu0  ;;  %v1466_v41 = vld [vmem:[#allocation2] sm:$0xff]  }
 0x145   : > { %v1277_v44 = vpop.f32.mrb[3].mxu0 }
 0x146   : > { %v1886_v45 = vadd.f32 %v1277_v44, %v1276_v43  ;;  %v1468_v43 = vld [vmem:[#allocation2 + $0x10] sm:$0xff]   ;;  %v1471_v44 = vld [vmem:[%s2048_s5 + $0x4] ss:$8 sps:$4 sm:$0xff]  }
 0x14a   : > { %v1279_v46 = vpop.f32.mrb[4].mxu0 }
 0x14b   : > { %v1280_v47 = vpop.f32.mrb[5].mxu0 }
 0x14c   : > { %v1888_v48 = vadd.f32 %v1280_v47, %v1279_v46  ;;  %v1282_v49 = vpop.f32.mrb[6].mxu0  ;;  %v1474_v46 = vld [vmem:[%s2048_s5 + $0x14] ss:$8 sps:$4 sm:$0xff]   ;;  %v1472_v47 = vld [vmem:[%s2048_s5 + $0x10] ss:$8 sps:$4 sm:$0xff]  }
 0x14d   : > { %v1283_v50 = vpop.f32.mrb[7].mxu0 }
 0x14e   : > { %v1890_v51 = vadd.f32 %v1283_v50, %v1282_v49  ;;  %v1475_v49 = vld [vmem:[%s2048_s5 + $0x20] ss:$8 sps:$4 sm:$0xff]   ;;  %v1480_v50 = vld [vmem:[%s2048_s5 + $0x34] ss:$8 sps:$4 sm:$0xff]  }
 0x152   : > { %v1285_v52 = vpop.f32.mrb[8].mxu0 }
 0x153   : > { %v1286_v53 = vpop.f32.mrb[9].mxu0 }
 0x154   : > { %v1892_v54 = vadd.f32 %v1286_v53, %v1285_v52  ;;  %v1288_v55 = vpop.f32.mrb[10].mxu0 }
 0x155   : > { %v1289_v56 = vpop.f32.mrb[11].mxu0 }
 0x156   : > { %v1894_v57 = vadd.f32 %v1289_v56, %v1288_v55 }
 0x15a   : > { %v1291_v59 = vpop.f32.mrb[12].mxu0 }
 0x15b   : > { %v1292_v60 = vpop.f32.mrb[13].mxu0 }
 0x15c   : > { %v1293_v61 = vadd.f32 %v1292_v60, %v1291_v59  ;;  %v1294_v62 = vpop.f32.mrb[14].mxu0 }
 0x15d   : > { %v1295_v63 = vpop.f32.mrb[15].mxu0 }
 0x15e   : > { %v1296_v0 = vadd.f32 %v1295_v63, %v1294_v62 }
 0x160   : > { %v1406_v1 = vpack.i.bf16 %v1296_v0, %v1293_v61 }
 0x162   : > { %v1297_v2 = vpop.f32.mrb[16].mxu0  ;;  %1407 = vrot.lane.b32.xlu0 %v1406_v1, %s1640_s11 }
 0x163   : > { %v1298_v3 = vpop.f32.mrb[17].mxu0 }
 0x164   : > { %v1299_v4 = vadd.f32 %v1298_v3, %v1297_v2  ;;  %v1300_v5 = vpop.f32.mrb[18].mxu0 }
 0x165   : > { %v1301_v6 = vpop.f32.mrb[19].mxu0 }
 0x166   : > { %v1302_v7 = vadd.f32 %v1301_v6, %v1300_v5 }
 0x168   : > { %v1411_v8 = vpack.i.bf16 %v1302_v7, %v1299_v4 }
 0x16a   : > { %v1303_v9 = vpop.f32.mrb[20].mxu0  ;;  %1412 = vrot.lane.b32.xlu0 %v1411_v8, %s1640_s11 }
 0x16b   : > { %v1304_v10 = vpop.f32.mrb[21].mxu0 }
 0x16c   : > { %v1305_v11 = vadd.f32 %v1304_v10, %v1303_v9  ;;  %v1306_v12 = vpop.f32.mrb[22].mxu0 }
 0x16d   : > { %v1307_v13 = vpop.f32.mrb[23].mxu0 }
 0x16e   : > { %v1308_v14 = vadd.f32 %v1307_v13, %v1306_v12  ;;  %633 = vperm.xlu0 %1422, %v621_v18  }
 0x170   : > { %v1416_v15 = vpack.i.bf16 %v1308_v14, %v1305_v11 }
 0x172   : > { %1417 = vrot.lane.b32.xlu1 %v1416_v15, %s1640_s11  ;;  %648 = vperm.xlu0 %1422, %v624_v20  }
 0x176   : > { %628 = vperm.xlu1 %1421, %v620_v16  }
 0x17a   : > { %638 = vperm.xlu1 %1421, %v622_v19  }
 0x17e   : > { %643 = vperm.xlu1 %1421, %v623_v21  }
 0x182   : > { %653 = vperm.xlu1 %1421, %v625_v22  }
 0x1d4   : > { %v1408_v23 = vpop.permute.xlu0 %1407 }
 0x1d5   : > { %v1410_v24 = vunpack.i.h.bf16 %v1408_v23  ;;  %v1409_v25 = vunpack.i.l.bf16 %v1408_v23 }
 0x1d7   : > { %v605_v26 = vsel %vm604_vm1, %v1884_v42, %v1409_v25  ;;  %v606_v27 = vsel %vm604_vm1, %v1886_v45, %v1410_v24  ;;  %v1467_v42 = vld [vmem:[#allocation2 + $0x8] sm:$0xff]  }
 0x1d8   : > { %v617_v28 = vpack.c.bf16 %v606_v27, %v605_v26  ;;  %v1469_v45 = vld [vmem:[%s2048_s5] ss:$8 sps:$4 sm:$0xff]  }
 0x1da   : > { %1316 = vmatpush3.bf16.msra.mxu1 %v617_v28 }
 0x1db   : > { %1317 = vmatprep.subr.bf16.mxu1 %v1639_v58 }
 0x1dc   : > { %v1413_v29 = vpop.permute.xlu0 %1412 }
 0x1dd   : > { %v1415_v30 = vunpack.i.h.bf16 %v1413_v29  ;;  %v1414_v31 = vunpack.i.l.bf16 %v1413_v29 }
 0x1df   : > { %v607_v32 = vsel %vm604_vm1, %v1888_v48, %v1414_v31  ;;  %v608_v33 = vsel %vm604_vm1, %v1890_v51, %v1415_v30  ;;  %v1477_v48 = vld [vmem:[%s2048_s5 + $0x24] ss:$8 sps:$4 sm:$0xff]   ;;  %v1478_v51 = vld [vmem:[%s2048_s5 + $0x30] ss:$8 sps:$4 sm:$0xff]  }
 0x1e0   : > { %v618_v34 = vpack.c.bf16 %v608_v33, %v607_v32  ;;  %v780_v30 = vld [vmem:[#allocation5] sm:$0xff]  ;;  %v781_v31 = vld [vmem:[#allocation5 + $0x8] sm:$0xff] }
 0x1e2   : > { %1318 = vmatpush3.bf16.msra.mxu1 %v618_v34 }
 0x1e3   : > { %1319 = vmatprep.subr.bf16.mxu1 %v1639_v58 }
 0x1e4   : > { %v1418_v35 = vpop.permute.xlu1 %1417 }
 0x1e5   : > { %v1420_v36 = vunpack.i.h.bf16 %v1418_v35  ;;  %v1419_v37 = vunpack.i.l.bf16 %v1418_v35 }
 0x1e7   : > { %v609_v38 = vsel %vm604_vm1, %v1892_v54, %v1419_v37  ;;  %v610_v39 = vsel %vm604_vm1, %v1894_v57, %v1420_v36 }
 0x1e8   : > { %v619_v40 = vpack.c.bf16 %v610_v39, %v609_v38 }
 0x1ea   : > { %1320 = vmatpush3.bf16.msra.mxu1 %v619_v40 }
 0x1eb   : > { %888 = vmatprep.subr.bf16.mxu1 %v1471_v44  ;;  %v782_v44 = vld [vmem:[#allocation5 + $0x10] sm:$0xff] }
 0x1ed   : > { %1322 = vmatmul.mubr.msk.bf16.vlgmr.msra.gmra.mrb[0].mxu1 %vm671_vm2, %v1466_v41  ;;  %v634_v56 = vpop.permute.xlu0 %633 }
 0x1ee   : > { %1325 = vmatprep.mubr.msk.bf16.mxu1 %vm1641_vm0, %v1639_v58  ;;  %889 = vmatpush1.bf16.msra.mxu1 %v1469_v45  ;;  %v783_v45 = vld [vmem:[#allocation5 + $0x18] sm:$0xff] }
 0x1ef   : > { %890 = vmatprep.subr.bf16.mxu1 %v1474_v46 }
 0x1f1   : > { %v649_v10 = vpop.permute.xlu0 %648 }
 0x1f2   : > { %891 = vmatpush1.bf16.msra.mxu1 %v1472_v47 }
 0x1f3   : > { %892 = vmatprep.subr.bf16.mxu1 %v1477_v48 }
 0x1f5   : > { %1326 = vmatmul.mubr.msk.bf16.gmra.mrb[4].mxu1 %vm671_vm2, %v1467_v42  ;;  %v629_v52 = vpop.permute.xlu1 %628 }
 0x1f6   : > { %1329 = vmatprep.mubr.msk.bf16.mxu1 %vm1641_vm0, %v1639_v58  ;;  %893 = vmatpush1.bf16.msra.mxu1 %v1475_v49 }
 0x1f7   : > { %894 = vmatprep.subr.bf16.mxu1 %v1480_v50 }
 0x1f9   : > { %v639_v61 = vpop.permute.xlu1 %638 }
 0x1fa   : > { %895 = vmatpush1.bf16.msra.mxu1 %v1478_v51 }
 0x1fd   : > { %1330 = vmatmul.mubr.msk.bf16.gmra.mrb[8].mxu1 %vm671_vm2, %v1468_v43  ;;  %v644_v2 = vpop.permute.xlu1 %643 }
 0x1fe   : > { %920 = vmatprep.mubr.bf16.mxu1 %v1642_v17 }
 0x201   : > { %v654_v15 = vpop.permute.xlu1 %653 }
 0x2c0   : > { %v715_v53 = vpop.f32.mrb[0].mxu1 }
 0x2c1   : > { %v716_v54 = vadd.f32 %v715_v53, %v629_v52  ;;  %v1323_v55 = vpop.f32.mrb[1].mxu1 }
 0x2c2   : > { %v718_v57 = vpop.f32.mrb[2].mxu1  ;;  %v785_v55 = vld [vmem:[#allocation5 + $0x28] sm:$0xff] }
 0x2c3   : > { %v1208_v58 = vmul.f32 -1.442695, %v716_v54  ;;  %v719_v59 = vadd.f32 %v718_v57, %v634_v56  ;;  %v1324_v60 = vpop.f32.mrb[3].mxu1 }
 0x2c5   : > { %1481 = vpow2.f32 %v1208_v58  ;;  %v1209_v62 = vmul.f32 -1.442695, %v719_v59 }
 0x2c7   : > { %1483 = vpow2.f32 %v1209_v62 }
 0x2c8   : > { %v723_v63 = vpop.f32.mrb[4].mxu1 }
 0x2c9   : > { %v724_v0 = vadd.f32 %v723_v63, %v639_v61  ;;  %v1327_v1 = vpop.f32.mrb[5].mxu1 }
 0x2ca   : > { %v726_v3 = vpop.f32.mrb[6].mxu1 }
 0x2cb   : > { %v1210_v4 = vmul.f32 -1.442695, %v724_v0  ;;  %v727_v5 = vadd.f32 %v726_v3, %v644_v2  ;;  %v1328_v6 = vpop.f32.mrb[7].mxu1 }
 0x2cd   : > { %1485 = vpow2.f32 %v1210_v4  ;;  %v1211_v7 = vmul.f32 -1.442695, %v727_v5 }
 0x2cf   : > { %v1482_v8 = vpop.eup %1481  ;;  %1487 = vpow2.f32 %v1211_v7 }
 0x2d0   : > { %v756_v9 = vadd.f32 1.0, %v1482_v8  ;;  %v731_v11 = vpop.f32.mrb[8].mxu1 }
 0x2d1   : > { %v1484_v12 = vpop.eup %1483  ;;  %v732_v13 = vadd.f32 %v731_v11, %v649_v10  ;;  %v1331_v14 = vpop.f32.mrb[9].mxu1 }
 0x2d2   : > { %1489 = vrcp.f32 %v756_v9  ;;  %v757_v16 = vadd.f32 1.0, %v1484_v12  ;;  %v734_v18 = vpop.f32.mrb[10].mxu1 }
 0x2d3   : > { %v1212_v19 = vmul.f32 -1.442695, %v732_v13  ;;  %v735_v20 = vadd.f32 %v734_v18, %v654_v15  ;;  %v1332_v21 = vpop.f32.mrb[11].mxu1 }
 0x2d4   : > { %1491 = vrcp.f32 %v757_v16 }
 0x2d5   : > { %1493 = vpow2.f32 %v1212_v19  ;;  %v1213_v22 = vmul.f32 -1.442695, %v735_v20 }
 0x2d7   : > { %v1486_v23 = vpop.eup %1485  ;;  %1495 = vpow2.f32 %v1213_v22 }
 0x2d8   : > { %v758_v24 = vadd.f32 1.0, %v1486_v23 }
 0x2d9   : > { %v1488_v25 = vpop.eup %1487 }
 0x2da   : > { %1497 = vrcp.f32 %v758_v24  ;;  %v759_v26 = vadd.f32 1.0, %v1488_v25 }
 0x2dc   : > { %v1490_v27 = vpop.eup %1489  ;;  %1499 = vrcp.f32 %v759_v26 }
 0x2dd   : > { %v774_v28 = vmul.f32 %v1490_v27, %v716_v54  ;;  %v784_v54 = vld [vmem:[#allocation5 + $0x20] sm:$0xff] }
 0x2de   : > { %v1492_v29 = vpop.eup %1491 }
 0x2df   : > { %v1494_v32 = vpop.eup %1493  ;;  %v775_v33 = vmul.f32 %v1492_v29, %v719_v59  ;;  %v786_v36 = vmul.f32 %v780_v30, %v774_v28 }
 0x2e0   : > { %v760_v34 = vadd.f32 1.0, %v1494_v32 }
 0x2e1   : > { %v1496_v35 = vpop.eup %1495  ;;  %v787_v37 = vmul.f32 %v781_v31, %v775_v33 }
 0x2e2   : > { %1501 = vrcp.f32 %v760_v34  ;;  %v761_v38 = vadd.f32 1.0, %v1496_v35 }
 0x2e3   : > { %v816_v39 = vpack.c.bf16 %v787_v37, %v786_v36  ;;  %v1423_v40 = vpack.i.bf16 %v787_v37, %v786_v36 }
 0x2e4   : > { %v1498_v41 = vpop.eup %1497  ;;  %1503 = vrcp.f32 %v761_v38 }
 0x2e5   : > { %v776_v42 = vmul.f32 %v1498_v41, %v724_v0  ;;  %1424 = vrot.lane.b32.xlu0 %v1423_v40, %s1640_s11  ;;  %1222 = vmatmul.mubr.msk.bf16.vlgmr.msra.gmra.mrb[12].mxu1 %vm604_vm1, %v816_v39 }
 0x2e6   : > { %v1500_v43 = vpop.eup %1499  ;;  %930 = vmatprep.mubr.bf16.mxu1 %v1642_v17 }
 0x2e7   : > { %v777_v46 = vmul.f32 %v1500_v43, %v727_v5  ;;  %v788_v47 = vmul.f32 %v782_v44, %v776_v42 }
 0x2e9   : > { %v789_v48 = vmul.f32 %v783_v45, %v777_v46 }
 0x2eb   : > { %v817_v49 = vpack.c.bf16 %v789_v48, %v788_v47  ;;  %v1428_v50 = vpack.i.bf16 %v789_v48, %v788_v47 }
 0x2ec   : > { %v1502_v51 = vpop.eup %1501 }
 0x2ed   : > { %v778_v52 = vmul.f32 %v1502_v51, %v732_v13  ;;  %1429 = vrot.lane.b32.xlu1 %v1428_v50, %s1640_s11  ;;  %1223 = vmatmul.mubr.msk.bf16.gmra.mrb[16].mxu1 %vm604_vm1, %v817_v49 }
 0x2ee   : > { %v1504_v53 = vpop.eup %1503  ;;  %940 = vmatprep.mubr.bf16.mxu1 %v1642_v17 }
 0x2ef   : > { %v779_v56 = vmul.f32 %v1504_v53, %v735_v20  ;;  %v790_v57 = vmul.f32 %v784_v54, %v778_v52 }
 0x2f1   : > { %v791_v58 = vmul.f32 %v785_v55, %v779_v56 }
 0x2f3   : > { %v818_v59 = vpack.c.bf16 %v791_v58, %v790_v57  ;;  %v1433_v60 = vpack.i.bf16 %v791_v58, %v790_v57 }
 0x2f5   : > { %1434 = vrot.lane.b32.xlu0 %v1433_v60, %s1640_s11  ;;  %1224 = vmatmul.mubr.msk.bf16.gmra.mrb[20].mxu1 %vm604_vm1, %v818_v59  ;;  %s1335_s11 = smul.u32 3072, %s1702_s25  ;;  %s2002_s25 = scalar_lea.sflag [#allocation4], %s275_s16 }
 0x2f6   : > { %950 = vmatprep.mubr.bf16.mxu1 %v1642_v17 }
 0x2f7   : > { %s1994_s20 = scalar_lea.hbm %s2049_s6, %s1335_s11 }
 0x357   : > { %v1425_v61 = vpop.permute.xlu0 %1424 }
 0x358   : > { %v1427_v62 = vunpack.i.h.bf16 %v1425_v61  ;;  %v1426_v63 = vunpack.i.l.bf16 %v1425_v61 }
 0x35a   : > { %v819_v0 = vpack.c.bf16 %v1427_v62, %v1426_v63 }
 0x35c   : > { %1225 = vmatmul.mubr.msk.bf16.gmra.mrb[24].mxu1 %vm604_vm1, %v819_v0 }
 0x35d   : > { %960 = vmatprep.mubr.bf16.mxu1 %v1642_v17 }
 0x35f   : > { %v1430_v1 = vpop.permute.xlu1 %1429 }
 0x360   : > { %v1432_v2 = vunpack.i.h.bf16 %v1430_v1  ;;  %v1431_v3 = vunpack.i.l.bf16 %v1430_v1 }
 0x362   : > { %v820_v4 = vpack.c.bf16 %v1432_v2, %v1431_v3 }
 0x364   : > { %1226 = vmatmul.mubr.msk.bf16.gmra.mrb[28].mxu1 %vm604_vm1, %v820_v4 }
 0x365   : > { %970 = vmatprep.mubr.bf16.mxu1 %v1642_v17 }
 0x367   : > { %v1435_v5 = vpop.permute.xlu0 %1434 }
 0x368   : > { %v1437_v6 = vunpack.i.h.bf16 %v1435_v5  ;;  %v1436_v7 = vunpack.i.l.bf16 %v1435_v5 }
 0x36a   : > { %v821_v8 = vpack.c.bf16 %v1437_v6, %v1436_v7 }
 0x36c   : > { %1227 = vmatmul.mubr.msk.bf16.gmra.mrb[32].mxu1 %vm604_vm1, %v821_v8 }
 0x3b8   : > { %v922_v9 = vpop.f32.mrb[12].mxu1 }
 0x3b9   : > { %v924_v10 = vpop.f32.mrb[13].mxu1 }
 0x3ba   : > { %v1245_v11 = vpack.c.bf16 %v924_v10, %v922_v9  ;;  %v926_v12 = vpop.f32.mrb[14].mxu1 }
 0x3bb   : > { %v928_v13 = vpop.f32.mrb[15].mxu1 }
 0x3bc   : > { %1053 = vst [vmem:[%s1849_s9 + $0x30] sm:$0xff] %v1245_v11  ;;  %v1246_v14 = vpack.c.bf16 %v928_v13, %v926_v12 }
 0x3be   : > { %1054 = vst [vmem:[%s1849_s9 + $0x38] sm:$0xff] %v1246_v14 }
 0x3c0   : > { %v932_v15 = vpop.f32.mrb[16].mxu1 }
 0x3c1   : > { %v934_v17 = vpop.f32.mrb[17].mxu1 }
 0x3c2   : > { %v1247_v16 = vpack.c.bf16 %v934_v17, %v932_v15  ;;  %v936_v18 = vpop.f32.mrb[18].mxu1 }
 0x3c3   : > { %v938_v19 = vpop.f32.mrb[19].mxu1 }
 0x3c4   : > { %1055 = vst [vmem:[%s1849_s9 + $0x40] sm:$0xff] %v1247_v16  ;;  %v1248_v20 = vpack.c.bf16 %v938_v19, %v936_v18 }
 0x3c6   : > { %1056 = vst [vmem:[%s1849_s9 + $0x48] sm:$0xff] %v1248_v20 }
 0x3c8   : > { %v942_v21 = vpop.f32.mrb[20].mxu1 }
 0x3c9   : > { %v944_v22 = vpop.f32.mrb[21].mxu1 }
 0x3ca   : > { %v1249_v23 = vpack.c.bf16 %v944_v22, %v942_v21  ;;  %v946_v24 = vpop.f32.mrb[22].mxu1 }
 0x3cb   : > { %v948_v25 = vpop.f32.mrb[23].mxu1 }
 0x3cc   : > { %1057 = vst [vmem:[%s1849_s9 + $0x50] sm:$0xff] %v1249_v23  ;;  %v1250_v26 = vpack.c.bf16 %v948_v25, %v946_v24 }
 0x3ce   : > { %1058 = vst [vmem:[%s1849_s9 + $0x58] sm:$0xff] %v1250_v26 }
 0x42f   : > { %v952_v27 = vpop.f32.mrb[24].mxu1 }
 0x430   : > { %v954_v28 = vpop.f32.mrb[25].mxu1 }
 0x431   : > { %v1251_v29 = vpack.c.bf16 %v954_v28, %v952_v27  ;;  %v956_v30 = vpop.f32.mrb[26].mxu1 }
 0x432   : > { %v958_v31 = vpop.f32.mrb[27].mxu1 }
 0x433   : > { %1059 = vst [vmem:[%s1849_s9 + $0x90] sm:$0xff] %v1251_v29  ;;  %v1252_v32 = vpack.c.bf16 %v958_v31, %v956_v30 }
 0x435   : > { %1060 = vst [vmem:[%s1849_s9 + $0x98] sm:$0xff] %v1252_v32 }
 0x437   : > { %v962_v33 = vpop.f32.mrb[28].mxu1 }
 0x438   : > { %v964_v34 = vpop.f32.mrb[29].mxu1 }
 0x439   : > { %v1253_v35 = vpack.c.bf16 %v964_v34, %v962_v33  ;;  %v966_v36 = vpop.f32.mrb[30].mxu1 }
 0x43a   : > { %v968_v37 = vpop.f32.mrb[31].mxu1 }
 0x43b   : > { %1061 = vst [vmem:[%s1849_s9 + $0xa0] sm:$0xff] %v1253_v35  ;;  %v1254_v38 = vpack.c.bf16 %v968_v37, %v966_v36 }
 0x43d   : > { %1062 = vst [vmem:[%s1849_s9 + $0xa8] sm:$0xff] %v1254_v38 }
 0x43f   : > { %v972_v39 = vpop.f32.mrb[32].mxu1 }
 0x440   : > { %v974_v40 = vpop.f32.mrb[33].mxu1 }
 0x441   : > { %v1255_v41 = vpack.c.bf16 %v974_v40, %v972_v39  ;;  %v976_v42 = vpop.f32.mrb[34].mxu1 }
 0x442   : > { %v978_v43 = vpop.f32.mrb[35].mxu1 }
 0x443   : > { %1063 = vst [vmem:[%s1849_s9 + $0xb0] sm:$0xff] %v1255_v41  ;;  %v1256_v44 = vpack.c.bf16 %v978_v43, %v976_v42 }
 0x445   : > { %1064 = vst [vmem:[%s1849_s9 + $0xb8] sm:$0xff] %v1256_v44 }
 0x446   : > { %1574 = shalt.err (!%p1571_p11)
}
 0x447   : > { %s1575_s16 = scalar_lea.hbm %s1994_s20, 3072  ;;  %s1579_s13 = scalar_lea.hbm %s2049_s6, 6144 }
 0x448   : > { %p1576_p13 = scmp.ne.s32.totalorder %s1994_s20, %s1575_s16  ;;  %p1580_p6 = scmp.lt.u32.totalorder %s1994_s20, %s2049_s6 }
 0x449   : > { %p1581_p9 = scmp.lt.u32.totalorder %s1579_s13, %s1575_s16  ;;  %p1583_p10 = scmp.lt.u32.totalorder %s1575_s16, %s1994_s20 }
 0x44a   : > { %p1577_p0 = pnand %p1576_p13, %p2062_p1 }
 0x44b   : > { %p1582_p12 = por %p1581_p9, %p1580_p6 }
 0x44c   : > { %p1578_p5 = pneg %p1577_p0 }
 0x44d   : > { %p1584_p2 = por %p1583_p10, %p1582_p12 }
 0x44f   : > { %p1585_p3 = pnand %p1584_p2, %p1578_p5 }
 0x451   : > { %1588 = shalt.err (!%p1585_p3)
}
 0x452   : > { %s1644_s11 = smov 128   ;;  %s1645_s18 = smov 8  }
 0x453   : > { %1344 = dma.vmem_to_hbm [thread:$0]  (%p2062_p1), %s1996_s17, 3072, %s1994_s20, %s2002_s25, %s1644_s11, %s1644_s11, %s1645_s18  }
 0x454 PF: > { %p1361_p4 = scmp.ge.s32.totalorder %s1631_s24, 2  ;;  %s1095_s19 = sand.u32 1, %s1619_s21  }
 0x455   : > { %p2063_p7 = scmp.ne.s32.totalorder %s2054_s8, 0  ;;  %s1096_s26 = scalar_lea.sflag [#allocation4], %s1095_s19 }
 0x457   : > { %p1354_p8 = pnand %p1361_p4, %p2063_p7 }
 0x459   : > { %1614 = dma.done.wait (!%p1354_p8), %s1096_s26, 3072  }
 0x45a   : > { %1616 = vsyncadd (!%p1354_p8), %s1096_s26, 4294964224  ;;  %p18_p11 = scmp.ge.s32.totalorder %s1706_s27, 4   ;;  %s2064_s21 = smov %s1623_s22 }
 0x45b   : > { %s2065_s22 = smov %s1627_s23  ;;  %s2066_s23 = smov %s1717_s30 }
 0x45c   : > { %s2067_s24 = smov %s1706_s27  ;;  %20 = sbr.rel (!%p18_p11) target bundleno = 5 (0x5), region = 88 }
 0x463   :  { %1101 = vsyncpa [#allocation3], 1 }
 0x464   :  { %1103 = vsyncpa [#allocation3 + $0x1], 1 }
 0x465   :  { %1104 = vsyncpa [#allocation6], 1 }
 0x466   :  { %1105 = vsyncpa [#allocation4], 1 }
 0x467   :  { %1107 = vsyncpa [#allocation4 + $0x1], 1 }

</bundles_post_ra>
